<compile_context>
chip_gen: v7x
topology: tpu7x:2x2x1
jax: 0.10.0
libtpu: 0.0.40
codegen_flags: <defaults>
</compile_context>

<pallas_src>
import functools

import jax
import jax.numpy as jnp
from jax import lax
from jax.experimental import pallas as pl
from jax.experimental.pallas import tpu as pltpu

# cfg.MODEL.MATCHER.{ALPHA, BETA, GAMA} — deterministic synthetic config values.
ALPHA, BETA, GAMA = 0.8, 0.2, 0.6

_BIG = 1e4                        # kornia-style geodesic border value for the erosion
_VMEM_BUDGET = 24 * 1024 * 1024   # keep pipeline footprint well under the scoped limit


def _round_up(x, m):
    return (x + m - 1) // m * m


# --------------------------------------------------------------------------- #
# Edge kernel: edge = targets - erosion_5x5(targets), separable min-pool.
# Input block is a lane-dense slab (ME*HP, WP): each target image is padded with
# 2 rows / 2 cols of _BIG (HP = round_up(H+4, 8), WP = round_up(W+4, 128)).  The
# pads both reproduce geodesic border handling and isolate neighbouring images so
# the sublane rolls never mix targets at real pixels.
# --------------------------------------------------------------------------- #
def _edge_kernel(t_ref, e_ref):
    t = t_ref[...]
    R, WP = t.shape
    # Vertical 5-tap min (rows r-2 .. r+2).  Window is symmetric, so the roll
    # direction convention is irrelevant; shifts are kept positive.
    v = t
    for d in (1, 2):
        v = jnp.minimum(v, jnp.minimum(pltpu.roll(t, shift=d, axis=0),
                                       pltpu.roll(t, shift=R - d, axis=0)))
    # Horizontal 5-tap min (cols c-2 .. c+2).  Row-internal _BIG pads absorb the
    # window at image borders, so no masking is needed for real pixels.
    ero = v
    for d in (1, 2):
        ero = jnp.minimum(ero, jnp.minimum(pltpu.roll(v, shift=d, axis=1),
                                           pltpu.roll(v, shift=WP - d, axis=1)))
    e_ref[...] = t - ero


def _pick_edge_tile(hp, wp):
    """Images per edge block: keep (in + out) double-buffered slabs ~<= 4 MiB."""
    bytes_per_img = hp * wp * 4
    me = max(1, (4 * 1024 * 1024) // (4 * bytes_per_img))
    return min(me, 16)


# --------------------------------------------------------------------------- #
# Score kernel (hot path): one row-tile of predictions vs. all (padded) targets.
# --------------------------------------------------------------------------- #
def _score_kernel(alpha, beta,
                  pm_ref, pe_ref, obj_ref, tm_ref, te_ref, tmn_ref, ten_ref,
                  out_ref):
    # pm/pe : (TM, K)  bf16 logits (streamed, double-buffered)
    # obj   : (TM, 1)  f32, = sigmoid(obj_logit)^gama (precomputed per row)
    # tm/te : (K, MP)  bf16 targets, pre-transposed (VMEM-resident across grid steps)
    # tmn/ten: (1, MP) f32 hoisted target squared-norms
    pm32 = jax.nn.sigmoid(pm_ref[...].astype(jnp.float32))   # f32 sigmoid: v5e-safe
    pe32 = jax.nn.sigmoid(pe_ref[...].astype(jnp.float32))

    # Standard (TM,K)@(K,MP) MXU form — rhs already transposed in the wrapper.
    num_m = 2.0 * jnp.dot(pm32.astype(jnp.bfloat16), tm_ref[...],
                          preferred_element_type=jnp.float32)
    num_e = 2.0 * jnp.dot(pe32.astype(jnp.bfloat16), te_ref[...],
                          preferred_element_type=jnp.float32)

    den_m = (pm32 * pm32).sum(-1, keepdims=True) + tmn_ref[...] + 1e-4
    den_e = (pe32 * pe32).sum(-1, keepdims=True) + ten_ref[...] + 1e-4

    ms = num_m * pl.reciprocal(den_m, approx=True)
    es = num_e * pl.reciprocal(den_e, approx=True)

    # ms^alpha * es^beta * obj fused into 2 logs + 1 exp; exact zeros preserved
    # (matches 0**p == 0 in the reference) via the final where.
    tiny = 1e-30
    logscore = (alpha * jnp.log(jnp.maximum(ms, tiny))
                + beta * jnp.log(jnp.maximum(es, tiny)))
    val = jnp.exp(logscore) * obj_ref[...]
    out_ref[...] = jnp.where((num_m > 0.0) & (num_e > 0.0), val, 0.0)


def _pick_row_tile(bn, k, mp):
    """Largest row tile (multiple of 8) whose pipeline footprint fits the VMEM budget."""
    def bytes_needed(tm):
        stream = 2 * (2 * tm * k * 2)          # pm, pe: double-buffered bf16 tiles
        resident = 2 * (2 * k * mp * 2)        # transposed tgt masks / edges
        small = 2 * (2 * mp * 4) + 2 * (2 * tm * 4)  # norms + obj factor
        out = 2 * tm * mp * 4                  # f32 output tile, double-buffered
        return stream + resident + small + out

    cap = _round_up(bn, 8)
    for tm in (512, 256, 128, 64, 32, 16, 8):
        tm = min(tm, cap)
        if bytes_needed(tm) <= _VMEM_BUDGET or tm <= 8:
            return tm
    return 8


def matcher_scores(pred_mask_logits, pred_edge_logits, pred_obj_logits, tgt_masks,
                   alpha=ALPHA, beta=BETA, gama=GAMA):
    """Computes the Matcher score matrix (B, N, M) with Pallas TPU kernels."""
    B, N, H, W = pred_mask_logits.shape
    M = tgt_masks.shape[0]
    if M == 0:
        # mirrors the empty-targets early-exit in the reference forward
        return jnp.zeros((B, N, 0), jnp.float32)

    BN, K = B * N, H * W
    tgt_masks_f = tgt_masks.astype(jnp.float32)
    # TODO(synk): nested_masks_from_list + bilinear F.interpolate to (H, W) are
    # host-side target rasterization; targets here are assumed already at (H, W).

    # ---- target edges: separable 5x5 erosion on lane-dense, pipelined slabs ----
    HP = _round_up(H + 4, 8)
    WP = _round_up(W + 4, 128)
    ME = _pick_edge_tile(HP, WP)
    MEP = _round_up(M, ME)
    # _BIG padding: spatial pads reproduce the geodesic border; padded images are
    # all-_BIG (edge == 0 there) and get sliced off below.
    tpad = jnp.pad(tgt_masks_f,
                   ((0, MEP - M), (2, HP - H - 2), (2, WP - W - 2)),
                   constant_values=_BIG)                        # (MEP, HP, WP)
    t2d = tpad.reshape(MEP * HP, WP)
    edge2d = pl.pallas_call(
        _edge_kernel,
        out_shape=jax.ShapeDtypeStruct(t2d.shape, jnp.float32),
        grid=(MEP // ME,),
        in_specs=[pl.BlockSpec((ME * HP, WP), lambda i: (i, 0))],
        out_specs=pl.BlockSpec((ME * HP, WP), lambda i: (i, 0)),
        compiler_params=pltpu.CompilerParams(
            dimension_semantics=("parallel",),
            vmem_limit_bytes=48 * 1024 * 1024,
        ),
    )(t2d)
    tgt_edges = edge2d.reshape(MEP, HP, WP)[:M, 2:2 + H, 2:2 + W]  # (M, H, W)

    # ---- flatten + pad everything for the row-tiled score kernel --------------
    MP = _round_up(M, 128)            # dense output lanes / full MXU columns
    TM = _pick_row_tile(BN, K, MP)
    BNP = _round_up(BN, TM)

    tm32 = tgt_masks_f.reshape(M, K)
    te32 = tgt_edges.reshape(M, K)
    tm_norm = jnp.pad((tm32 * tm32).sum(-1), (0, MP - M)).reshape(1, MP)
    te_norm = jnp.pad((te32 * te32).sum(-1), (0, MP - M)).reshape(1, MP)
    # pre-transpose targets to (K, MP): kernel matmul is then the native
    # (rows, K) @ (K, MP) MXU form with no in-kernel rhs transpose.
    tm_b = jnp.pad(tm32, ((0, MP - M), (0, 0))).astype(jnp.bfloat16).T  # (K, MP)
    te_b = jnp.pad(te32, ((0, MP - M), (0, 0))).astype(jnp.bfloat16).T  # (K, MP)

    pm_b = jnp.pad(pred_mask_logits.reshape(BN, K),
                   ((0, BNP - BN), (0, 0))).astype(jnp.bfloat16)
    pe_b = jnp.pad(pred_edge_logits.reshape(BN, K),
                   ((0, BNP - BN), (0, 0))).astype(jnp.bfloat16)
    # per-row objectness factor sigmoid(obj)^gama, computed once outside the loop
    obj_f = jnp.exp(gama * jax.nn.log_sigmoid(
        pred_obj_logits.reshape(BN, 1).astype(jnp.float32)))
    obj_f = jnp.pad(obj_f, ((0, BNP - BN), (0, 0)))

    # ---- dice matmuls + fused score combination (the hot path) ----------------
    # TODO(synk): for very large H*W add a trailing "arbitrary" K grid axis with f32
    # VMEM accumulators so the pixel dimension need not fit a single VMEM tile (v7x).
    score = pl.pallas_call(
        functools.partial(_score_kernel, alpha, beta),
        out_shape=jax.ShapeDtypeStruct((BNP, MP), jnp.float32),
        grid=(BNP // TM,),
        in_specs=[
            pl.BlockSpec((TM, K), lambda i: (i, 0)),   # pred mask logits (bf16 stream)
            pl.BlockSpec((TM, K), lambda i: (i, 0)),   # pred edge logits (bf16 stream)
            pl.BlockSpec((TM, 1), lambda i: (i, 0)),   # obj factor (f32)
            pl.BlockSpec((K, MP), lambda i: (0, 0)),   # tgt masks^T (resident)
            pl.BlockSpec((K, MP), lambda i: (0, 0)),   # tgt edges^T (resident)
            pl.BlockSpec((1, MP), lambda i: (0, 0)),   # tgt mask norms (resident)
            pl.BlockSpec((1, MP), lambda i: (0, 0)),   # tgt edge norms (resident)
        ],
        out_specs=pl.BlockSpec((TM, MP), lambda i: (i, 0)),
        compiler_params=pltpu.CompilerParams(
            dimension_semantics=("parallel",),          # shards rows across v7x TCs
            vmem_limit_bytes=48 * 1024 * 1024,
        ),
        cost_estimate=pl.CostEstimate(
            flops=4 * BNP * MP * K,
            transcendentals=3 * BNP * MP + 2 * BNP * K,
            bytes_accessed=2 * BNP * K * 2 + 2 * MP * K * 2 + BNP * MP * 4,
        ),
    )(pm_b, pe_b, obj_f, tm_b, te_b, tm_norm, te_norm)

    return score[:BN, :M].reshape(B, N, M)


# --------------------------------------------------------------------------- #
# Pure-JAX reference (same semantics as the PyTorch Matcher forward) for checking.
# --------------------------------------------------------------------------- #
def _reference_scores(pm, pe, po, tmasks, alpha, beta, gama):
    B, N, H, W = pm.shape
    M = tmasks.shape[0]
    t = tmasks.astype(jnp.float32)
    tp = jnp.pad(t, ((0, 0), (2, 2), (2, 2)), constant_values=_BIG)
    ero = tp[:, 2:2 + H, 2:2 + W]
    for dy in range(5):
        for dx in range(5):
            ero = jnp.minimum(ero, tp[:, dy:dy + H, dx:dx + W])
    tedge = t - ero

    pmf = jax.nn.sigmoid(pm.reshape(B * N, -1).astype(jnp.float32))
    pef = jax.nn.sigmoid(pe.reshape(B * N, -1).astype(jnp.float32))
    pof = jax.nn.sigmoid(po.reshape(B * N, 1).astype(jnp.float32))
    tmf = t.reshape(M, -1)
    tef = tedge.reshape(M, -1)

    def dice(a, b):
        num = 2.0 * (a @ b.T)
        den = (a * a).sum(-1)[:, None] + (b * b).sum(-1)[None, :]
        return num / (den + 1e-4)

    s = dice(pmf, tmf) ** alpha * dice(pef, tef) ** beta * pof ** gama
    return s.reshape(B, N, M)


if __name__ == "__main__":
    key = jax.random.PRNGKey(0)
    B, N, H, W = 2, 8, 16, 16
    sizes = [3, 4]                      # targets per image, M = sum(sizes)
    M = sum(sizes)

    k1, k2, k3, k4 = jax.random.split(key, 4)
    pred_masks = jax.random.normal(k1, (B, N, H, W), jnp.float32)   # logits
    pred_edges = jax.random.normal(k2, (B, N, H, W), jnp.float32)   # logits
    pred_obj = jax.random.normal(k3, (B, N, 1), jnp.float32)        # logits
    # synthetic binary GT masks already rasterized at (H, W)
    tgt_masks = (jax.random.uniform(k4, (M, H, W)) > 0.6).astype(jnp.float32)

    score = matcher_scores(pred_masks, pred_edges, pred_obj, tgt_masks)
    score = jax.block_until_ready(score)

    # TODO(synk): scipy.optimize.linear_sum_assignment (Hungarian matching over the
    # per-image score blocks split by `sizes`) is a host-side combinatorial op with
    # no Pallas equivalent; this script stops at the (B, N, M) score matrix.

    assert score.shape == (B, N, M)
    ref = _reference_scores(pred_masks, pred_edges, pred_obj, tgt_masks,
                            ALPHA, BETA, GAMA)
    assert bool(jnp.all(jnp.isfinite(score)))
    assert bool(jnp.allclose(score, ref, rtol=0.05, atol=5e-3)), (
        f"max abs err {float(jnp.max(jnp.abs(score - ref)))}")
    print("KERNEL_OK")
</pallas_src>

<mosaic_0001>
module attributes {stable_mosaic.version = 11 : i64} {
  func.func @_edge_kernel(%arg0: i32, %arg1: memref<384x128xf32, #tpu.memory_space<vmem>>, %arg2: memref<384x128xf32, #tpu.memory_space<vmem>>) attributes {dimension_semantics = [#tpu.dimension_semantics<parallel>], iteration_bounds = array<i64: 1>, scalar_prefetch = 0 : i64, scratch_operands = 0 : i64, tpu.core_type = #tpu.core_type<tc>, window_params = [{transform_indices = @transform_0, window_bounds = array<i64: 384, 128>}, {transform_indices = @transform_1, window_bounds = array<i64: 384, 128>}]} {
    %c0 = arith.constant 0 : index
    %c0_0 = arith.constant 0 : index
    %0 = vector.load %arg1[%c0, %c0_0] : memref<384x128xf32, #tpu.memory_space<vmem>>, vector<384x128xf32>
    %c1_i32 = arith.constant 1 : i32
    %1 = tpu.dynamic_rotate %0 by %c1_i32 dim 0 : vector<384x128xf32>, i32 -> vector<384x128xf32>
    %c383_i32 = arith.constant 383 : i32
    %2 = tpu.dynamic_rotate %0 by %c383_i32 dim 0 : vector<384x128xf32>, i32 -> vector<384x128xf32>
    %3 = arith.minimumf %1, %2 : vector<384x128xf32>
    %4 = arith.minimumf %0, %3 : vector<384x128xf32>
    %c2_i32 = arith.constant 2 : i32
    %5 = tpu.dynamic_rotate %0 by %c2_i32 dim 0 : vector<384x128xf32>, i32 -> vector<384x128xf32>
    %c382_i32 = arith.constant 382 : i32
    %6 = tpu.dynamic_rotate %0 by %c382_i32 dim 0 : vector<384x128xf32>, i32 -> vector<384x128xf32>
    %7 = arith.minimumf %5, %6 : vector<384x128xf32>
    %8 = arith.minimumf %4, %7 : vector<384x128xf32>
    %c1_i32_1 = arith.constant 1 : i32
    %9 = tpu.dynamic_rotate %8 by %c1_i32_1 dim 1 : vector<384x128xf32>, i32 -> vector<384x128xf32>
    %c127_i32 = arith.constant 127 : i32
    %10 = tpu.dynamic_rotate %8 by %c127_i32 dim 1 : vector<384x128xf32>, i32 -> vector<384x128xf32>
    %11 = arith.minimumf %9, %10 : vector<384x128xf32>
    %12 = arith.minimumf %8, %11 : vector<384x128xf32>
    %c2_i32_2 = arith.constant 2 : i32
    %13 = tpu.dynamic_rotate %8 by %c2_i32_2 dim 1 : vector<384x128xf32>, i32 -> vector<384x128xf32>
    %c126_i32 = arith.constant 126 : i32
    %14 = tpu.dynamic_rotate %8 by %c126_i32 dim 1 : vector<384x128xf32>, i32 -> vector<384x128xf32>
    %15 = arith.minimumf %13, %14 : vector<384x128xf32>
    %16 = arith.minimumf %12, %15 : vector<384x128xf32>
    %17 = arith.subf %0, %16 : vector<384x128xf32>
    %c0_3 = arith.constant 0 : index
    %c0_4 = arith.constant 0 : index
    %18 = vector.load %arg2[%c0_3, %c0_4] : memref<384x128xf32, #tpu.memory_space<vmem>>, vector<384x128xf32>
    tpu.vector_store %arg2[%c0_3, %c0_4], %17 {strides = array<i32>} : memref<384x128xf32, #tpu.memory_space<vmem>>, vector<384x128xf32>,
    return
  }
  func.func @transform_0(%arg0: i32) -> (i32, i32) {
    %c0_i32 = arith.constant 0 : i32
    %c0_i32_0 = arith.constant 0 : i32
    return %arg0, %c0_i32 : i32, i32
  }
  func.func @transform_1(%arg0: i32) -> (i32, i32) {
    %c0_i32 = arith.constant 0 : i32
    %c0_i32_0 = arith.constant 0 : i32
    return %arg0, %c0_i32 : i32, i32
  }
}

</mosaic_0001>

<bundles_post_ra>
// kernel: tpu_custom_call.1
= control target key start
LH: loop header
LB: loop body
LE: loop exit
PB: predicated region body
PF: predicated region fallthrough
CT: control target
= control target key end

     0   :  { %6 = vsyncpa [#allocation3], 0  ;;  %s3173_s0 = inlined_call_operand.hbm [shape: f32[384,128], index: 0, kind: input, shape index: {}]   ;;  %s3174_s1 = inlined_call_operand.hbm [shape: f32[384,128], index: 1, kind: output, shape index: {}]  }
   0x1   :  { %7 = vsyncpa [#allocation4], 0  ;;  %s1447_s6 = smov [#allocation2]   ;;  %s1399_s10 = scalar_lea.hbm %s3173_s0, 6144 }
   0x2   :  { %s13_s7 = sshll.u32 %s1447_s6, 4  ;;  %p1400_p0 = scmp.ne.s32.totalorder %s3173_s0, %s1399_s10  ;;  %s14_s7 = int_to_ptr.vmem [resolvable:$true] %s13_s7 }
   0x3   :  { %p1403_p1 = scmp.lt.u32.totalorder %s1399_s10, %s3173_s0 }
   0x5   :  { %p1405_p2 = pnand %p1403_p1, %p1400_p0 }
   0x7   :  { %1408 = shalt.err (!%p1405_p2)
}
   0x8   :  { %s1409_s15 = scalar_lea.vmem %s14_s7, 6144  ;;  %p1414_p4 = scmp.lt.s32.totalorder %s14_s7, %s14_s7 }
   0x9   :  { %p1410_p3 = scmp.ne.s32.totalorder %s14_s7, %s1409_s15  ;;  %p1415_p5 = scmp.lt.s32.totalorder %s1409_s15, %s1409_s15 }
   0xb   :  { %p1416_p6 = por %p1415_p5, %p1414_p4 }
   0xd   :  { %p1417_p7 = pnand %p1416_p6, %p1410_p3 }
   0xf   :  { %1420 = shalt.err (!%p1417_p7)
}
  0x10   :  { %s1448_s16 = smov 128   ;;  %s1449_s17 = smov 8  }
  0x11   :  { %19 = dma.hbm_to_vmem [thread:$0]  %s3173_s0, 6144, %s14_s7, [#allocation3], %s1448_s16, %s1448_s16, %s1449_s17  }
  0x12   :  { %1443 = dma.done.wait [#allocation3], 6144  }
  0x13   :  { %1444 = vsyncadd [#allocation3], 4294961152  ;;  %v119_v0 = vlaneseq  ;;  %v1483_v2 = vld [vmem:[#allocation2 + $0x8] sm:$0xff]  ;;  %v25_v3 = vld [vmem:[#allocation2 + $0x10] sm:$0xff]  ;;  %s1450_s0 = smov 1   ;;  %s1451_s20 = smov 127  }
  0x14   :  { %v1485_v4 = vld [vmem:[#allocation2 + $0x18] sm:$0xff]  ;;  %v72_v5 = vrot.slane %v1483_v2, 7  ;;  %v73_v6 = vrot.slane %v25_v3, 7  ;;  %v172_v7 = vrot.slane %v25_v3, 1  ;;  %v1492_v9 = vld [vmem:[#allocation2] sm:$0xff]  ;;  %v364_v11 = vrot.slane %v1483_v2, 6 }
  0x15   :  { %v1480_v1 = vshrl.u32 %v119_v0, 7  ;;  %v173_v8 = vrot.slane %v1485_v4, 1  ;;  %v1494_v10 = vld [vmem:[#allocation2 + $0x178] sm:$0xff]  ;;  %v365_v12 = vrot.slane %v25_v3, 6  ;;  %v462_v13 = vrot.slane %v25_v3, 2  ;;  %v1509_v23 = vld [vmem:[#allocation2 + $0x20] sm:$0xff] }
  0x16   :  { %v463_v14 = vrot.slane %v1485_v4, 2  ;;  %v71_v17 = vrot.slane %v1492_v9, 7  ;;  %v3178_v18 = vrot.slane %v1494_v10, 7  ;;  %v3177_v22 = vrot.slane %v1492_v9, 1  ;;  %v28_v48 = vld [vmem:[#allocation2 + $0x28] sm:$0xff]  ;;  %v1555_v52 = vld [vmem:[#allocation2 + $0x30] sm:$0xff] }
  0x17   :  { %vm121_vm0 = vcmp.lt.s32.totalorder %v1480_v1, 1  ;;  %vm218_vm1 = vcmp.lt.s32.totalorder %v1480_v1, 7  ;;  %vm411_vm2 = vcmp.lt.s32.totalorder %v1480_v1, 2  ;;  %vm508_vm3 = vcmp.lt.s32.totalorder %v1480_v1, 6  ;;  %s1452_s21 = smov 2   ;;  %s1453_s22 = smov 126  }
  0x18   :  { %v167_v15 = vsel %vm121_vm0, %v72_v5, %v73_v6  ;;  %v263_v16 = vsel %vm218_vm1, %v172_v7, %v173_v8  ;;  %v457_v20 = vsel %vm411_vm2, %v364_v11, %v365_v12  ;;  %v553_v21 = vsel %vm508_vm3, %v462_v13, %v463_v14  ;;  %s1454_s23 = smov [#allocation5]  }
  0x19   :  { %v269_v19 = vmin.f32 %v167_v15, %v263_v16  ;;  %v559_v24 = vmin.f32 %v457_v20, %v553_v21  ;;  %v169_v25 = vsel %vm121_vm0, %v3178_v18, %v71_v17  ;;  %v171_v26 = vrot.slane %v1483_v2, 1  ;;  %s1330_s24 = sshll.u32 %s1454_s23, 4  ;;  %s1331_s24 = int_to_ptr.vmem [resolvable:$true] %s1330_s24 }
  0x1a   :  { %v363_v27 = vrot.slane %v1492_v9, 6  ;;  %v3176_v29 = vrot.slane %v1494_v10, 6  ;;  %v3175_v30 = vrot.slane %v1492_v9, 2  ;;  %v461_v31 = vrot.slane %v1483_v2, 2  ;;  %s1421_s25 = scalar_lea.vmem %s1331_s24, 6144  ;;  %p1426_p9 = scmp.lt.s32.totalorder %s1331_s24, %s1331_s24 }
  0x1b   :  { %v317_v28 = vmin.f32 %v25_v3, %v269_v19  ;;  %v265_v32 = vsel %vm218_vm1, %v3177_v22, %v171_v26  ;;  %v74_v33 = vrot.slane %v1485_v4, 7  ;;  %v174_v34 = vrot.slane %v1509_v23, 1  ;;  %v1591_v19 = vld [vmem:[#allocation2 + $0x40] sm:$0xff]  ;;  %p1422_p8 = scmp.ne.s32.totalorder %s1331_s24, %s1421_s25  ;;  %p1427_p10 = scmp.lt.s32.totalorder %s1421_s25, %s1421_s25 }
  0x1c   :  { %v366_v35 = vrot.slane %v1485_v4, 6  ;;  %v267_v37 = vmin.f32 %v169_v25, %v265_v32  ;;  %v459_v38 = vsel %vm411_vm2, %v3176_v29, %v363_v27  ;;  %v555_v39 = vsel %vm508_vm3, %v3175_v30, %v461_v31 }
  0x1d   :  { %v1527_v36 = vmin.f32 %v317_v28, %v559_v24  ;;  %v557_v40 = vmin.f32 %v459_v38, %v555_v39  ;;  %v166_v41 = vsel %vm121_vm0, %v73_v6, %v74_v33  ;;  %v262_v42 = vsel %vm218_vm1, %v173_v8, %v174_v34  ;;  %p1428_p11 = por %p1427_p10, %p1426_p9 }
  0x1e   :  { %v456_v43 = vsel %vm411_vm2, %v365_v12, %v366_v35  ;;  %v315_v44 = vmin.f32 %v1492_v9, %v267_v37  ;;  %v270_v45 = vmin.f32 %v166_v41, %v262_v42  ;;  %v464_v46 = vrot.slane %v1509_v23, 2 }
  0x1f   :  { %657 = vrot.lane.b32.xlu1 %v1527_v36, %s1450_s0  ;;  %v168_v47 = vsel %vm121_vm0, %v71_v17, %v72_v5  ;;  %v264_v49 = vsel %vm218_vm1, %v171_v26, %v172_v7  ;;  %v458_v50 = vsel %vm411_vm2, %v363_v27, %v364_v11  ;;  %v554_v51 = vsel %vm508_vm3, %v461_v31, %v462_v13  ;;  %v1581_v13 = vld [vmem:[#allocation2 + $0x38] sm:$0xff]  ;;  %p1429_p12 = pnand %p1428_p11, %p1422_p8 }
  0x20   :  { %v75_v53 = vrot.slane %v1509_v23, 7  ;;  %v1558_v54 = vmin.f32 %v315_v44, %v557_v40  ;;  %v318_v55 = vmin.f32 %v1485_v4, %v270_v45  ;;  %v552_v56 = vsel %vm508_vm3, %v463_v14, %v464_v46  ;;  %v1618_v44 = vld [vmem:[#allocation2 + $0x48] sm:$0xff] }
  0x21   :  { %v268_v57 = vmin.f32 %v168_v47, %v264_v49  ;;  %v560_v58 = vmin.f32 %v456_v43, %v552_v56  ;;  %v558_v59 = vmin.f32 %v458_v50, %v554_v51  ;;  %v76_v60 = vrot.slane %v28_v48, 7  ;;  %v1628_v49 = vld [vmem:[#allocation2 + $0x50] sm:$0xff] }
  0x22   :  { %v175_v61 = vrot.slane %v28_v48, 1  ;;  %653 = vrot.lane.b32.xlu0 %v1558_v54, %s1450_s0  ;;  %v176_v63 = vrot.slane %v1555_v52, 1  ;;  %v367_v0 = vrot.slane %v1509_v23, 6  ;;  %v368_v3 = vrot.slane %v28_v48, 6 }
  0x23   :  { %v316_v62 = vmin.f32 %v1483_v2, %v268_v57  ;;  %v1568_v5 = vmin.f32 %v318_v55, %v560_v58  ;;  %v164_v4 = vsel %vm121_vm0, %v75_v53, %v76_v60  ;;  %v465_v6 = vrot.slane %v28_v48, 2 }
  0x24   :  { %v466_v7 = vrot.slane %v1555_v52, 2  ;;  %v260_v11 = vsel %vm218_vm1, %v175_v61, %v176_v63  ;;  %v454_v2 = vsel %vm411_vm2, %v367_v0, %v368_v3  ;;  %v165_v12 = vsel %vm121_vm0, %v74_v33, %v75_v53 }
  0x25   :  { %v1573_v8 = vmin.f32 %v316_v62, %v558_v59  ;;  %659 = vrot.lane.b32.xlu1 %v1568_v5, %s1450_s0  ;;  %v272_v14 = vmin.f32 %v164_v4, %v260_v11  ;;  %v261_v16 = vsel %vm218_vm1, %v174_v34, %v175_v61  ;;  %v455_v17 = vsel %vm411_vm2, %v366_v35, %v367_v0 }
  0x26   :  { %v550_v15 = vsel %vm508_vm3, %v465_v6, %v466_v7  ;;  %v271_v21 = vmin.f32 %v165_v12, %v261_v16  ;;  %v551_v24 = vsel %vm508_vm3, %v464_v46, %v465_v6  ;;  %v77_v25 = vrot.slane %v1555_v52, 7  ;;  %v1656_v12 = vld [vmem:[#allocation2 + $0x58] sm:$0xff] }
  0x27   :  { %655 = vrot.lane.b32.xlu0 %v1573_v8, %s1450_s0  ;;  %v562_v20 = vmin.f32 %v454_v2, %v550_v15  ;;  %v320_v26 = vmin.f32 %v28_v48, %v272_v14  ;;  %v561_v27 = vmin.f32 %v455_v17, %v551_v24  ;;  %v78_v28 = vrot.slane %v1581_v13, 7  ;;  %v1666_v17 = vld [vmem:[#allocation2 + $0x60] sm:$0xff] }
  0x28   :  { %v177_v31 = vrot.slane %v1581_v13, 1  ;;  %v319_v32 = vmin.f32 %v1509_v23, %v271_v21  ;;  %v178_v33 = vrot.slane %v1591_v19, 1  ;;  %v369_v34 = vrot.slane %v1555_v52, 6 }
  0x29   :  { %v370_v35 = vrot.slane %v1581_v13, 6  ;;  %v1604_v37 = vmin.f32 %v320_v26, %v562_v20  ;;  %v162_v38 = vsel %vm121_vm0, %v77_v25, %v78_v28  ;;  %v467_v39 = vrot.slane %v1581_v13, 2 }
  0x2a   :  { %v468_v40 = vrot.slane %v1591_v19, 2  ;;  %v1610_v41 = vmin.f32 %v319_v32, %v561_v27  ;;  %v258_v23 = vsel %vm218_vm1, %v177_v31, %v178_v33  ;;  %v163_v43 = vsel %vm121_vm0, %v76_v60, %v77_v25 }
  0x2b   :  { %v452_v42 = vsel %vm411_vm2, %v369_v34, %v370_v35  ;;  %663 = vrot.lane.b32.xlu1 %v1604_v37, %s1450_s0  ;;  %v274_v45 = vmin.f32 %v162_v38, %v258_v23  ;;  %v259_v47 = vsel %vm218_vm1, %v176_v63, %v177_v31  ;;  %v453_v48 = vsel %vm411_vm2, %v368_v3, %v369_v34 }
  0x2c   :  { %v548_v46 = vsel %vm508_vm3, %v467_v39, %v468_v40  ;;  %661 = vrot.lane.b32.xlu0 %v1610_v41, %s1450_s0  ;;  %v273_v51 = vmin.f32 %v163_v43, %v259_v47  ;;  %v549_v53 = vsel %vm508_vm3, %v466_v7, %v467_v39  ;;  %v79_v55 = vrot.slane %v1591_v19, 7 }
  0x2d   :  { %v564_v50 = vmin.f32 %v452_v42, %v548_v46  ;;  %v322_v56 = vmin.f32 %v1581_v13, %v274_v45  ;;  %v563_v57 = vmin.f32 %v453_v48, %v549_v53  ;;  %v80_v58 = vrot.slane %v1618_v44, 7  ;;  %v1694_v45 = vld [vmem:[#allocation2 + $0x68] sm:$0xff] }
  0x2e   :  { %v179_v59 = vrot.slane %v1618_v44, 1  ;;  %v321_v60 = vmin.f32 %v1555_v52, %v273_v51  ;;  %v180_v61 = vrot.slane %v1628_v49, 1  ;;  %v371_v62 = vrot.slane %v1591_v19, 6  ;;  %v1704_v51 = vld [vmem:[#allocation2 + $0x70] sm:$0xff] }
  0x2f   :  { %v372_v63 = vrot.slane %v1618_v44, 6  ;;  %v1642_v0 = vmin.f32 %v322_v56, %v564_v50  ;;  %v160_v3 = vsel %vm121_vm0, %v79_v55, %v80_v58  ;;  %v469_v4 = vrot.slane %v1618_v44, 2 }
  0x30   :  { %v470_v6 = vrot.slane %v1628_v49, 2  ;;  %v1648_v7 = vmin.f32 %v321_v60, %v563_v57  ;;  %v256_v52 = vsel %vm218_vm1, %v179_v59, %v180_v61  ;;  %v161_v2 = vsel %vm121_vm0, %v78_v28, %v79_v55 }
  0x31   :  { %v450_v11 = vsel %vm411_vm2, %v371_v62, %v372_v63  ;;  %667 = vrot.lane.b32.xlu1 %v1642_v0, %s1450_s0  ;;  %v276_v13 = vmin.f32 %v160_v3, %v256_v52  ;;  %v257_v15 = vsel %vm218_vm1, %v178_v33, %v179_v59  ;;  %v451_v16 = vsel %vm411_vm2, %v370_v35, %v371_v62 }
  0x32   :  { %v546_v14 = vsel %vm508_vm3, %v469_v4, %v470_v6  ;;  %665 = vrot.lane.b32.xlu0 %v1648_v7, %s1450_s0  ;;  %v275_v21 = vmin.f32 %v161_v2, %v257_v15  ;;  %v547_v24 = vsel %vm508_vm3, %v468_v40, %v469_v4  ;;  %v81_v25 = vrot.slane %v1628_v49, 7  ;;  %v1732_v15 = vld [vmem:[#allocation2 + $0x78] sm:$0xff] }
  0x33   :  { %v566_v20 = vmin.f32 %v450_v11, %v546_v14  ;;  %v324_v26 = vmin.f32 %v1618_v44, %v276_v13  ;;  %v565_v27 = vmin.f32 %v451_v16, %v547_v24  ;;  %v82_v28 = vrot.slane %v1656_v12, 7 }
  0x34   :  { %v181_v31 = vrot.slane %v1656_v12, 1  ;;  %v323_v32 = vmin.f32 %v1591_v19, %v275_v21  ;;  %v182_v33 = vrot.slane %v1666_v17, 1  ;;  %v373_v34 = vrot.slane %v1628_v49, 6 }
  0x35   :  { %v374_v35 = vrot.slane %v1656_v12, 6  ;;  %v1680_v38 = vmin.f32 %v324_v26, %v566_v20  ;;  %v158_v39 = vsel %vm121_vm0, %v81_v25, %v82_v28  ;;  %v471_v40 = vrot.slane %v1656_v12, 2 }
  0x36   :  { %v472_v23 = vrot.slane %v1666_v17, 2  ;;  %v1686_v42 = vmin.f32 %v323_v32, %v565_v27  ;;  %v254_v19 = vsel %vm218_vm1, %v181_v31, %v182_v33  ;;  %v159_v44 = vsel %vm121_vm0, %v80_v58, %v81_v25  ;;  %v1742_v25 = vld [vmem:[#allocation2 + $0x80] sm:$0xff] }
  0x37   :  { %v448_v43 = vsel %vm411_vm2, %v373_v34, %v374_v35  ;;  %671 = vrot.lane.b32.xlu1 %v1680_v38, %s1450_s0  ;;  %v278_v46 = vmin.f32 %v158_v39, %v254_v19  ;;  %v255_v48 = vsel %vm218_vm1, %v180_v61, %v181_v31  ;;  %v449_v50 = vsel %vm411_vm2, %v372_v63, %v373_v34 }
  0x38   :  { %3240 = vst [vmem:[#allocation8_spill] sm:$0xff] %v1686_v42  ;;  %v544_v47 = vsel %vm508_vm3, %v471_v40, %v472_v23  ;;  %669 = vrot.lane.b32.xlu0 %v1686_v42, %s1450_s0  ;;  %v277_v55 = vmin.f32 %v159_v44, %v255_v48  ;;  %v545_v56 = vsel %vm508_vm3, %v470_v6, %v471_v40  ;;  %v83_v57 = vrot.slane %v1666_v17, 7 }
  0x39   :  { %v568_v53 = vmin.f32 %v448_v43, %v544_v47  ;;  %v326_v58 = vmin.f32 %v1656_v12, %v278_v46  ;;  %v567_v59 = vmin.f32 %v449_v50, %v545_v56  ;;  %v84_v60 = vrot.slane %v1694_v45, 7 }
  0x3a   :  { %v183_v61 = vrot.slane %v1694_v45, 1  ;;  %v325_v62 = vmin.f32 %v1628_v49, %v277_v55  ;;  %v184_v63 = vrot.slane %v1704_v51, 1  ;;  %v375_v3 = vrot.slane %v1666_v17, 6 }
  0x3b   :  { %v376_v4 = vrot.slane %v1694_v45, 6  ;;  %v1718_v52 = vmin.f32 %v326_v58, %v568_v53  ;;  %v156_v6 = vsel %vm121_vm0, %v83_v57, %v84_v60  ;;  %v473_v11 = vrot.slane %v1694_v45, 2  ;;  %v1770_v53 = vld [vmem:[#allocation2 + $0x88] sm:$0xff] }
  0x3c   :  { %v474_v2 = vrot.slane %v1704_v51, 2  ;;  %v1724_v12 = vmin.f32 %v325_v62, %v567_v59  ;;  %v252_v49 = vsel %vm218_vm1, %v183_v61, %v184_v63  ;;  %v157_v14 = vsel %vm121_vm0, %v82_v28, %v83_v57  ;;  %v1780_v59 = vld [vmem:[#allocation2 + $0x90] sm:$0xff] }
  0x3d   :  { %3241 = vst [vmem:[#allocation9_spill] sm:$0xff] %v1718_v52  ;;  %v446_v13 = vsel %vm411_vm2, %v375_v3, %v376_v4  ;;  %675 = vrot.lane.b32.xlu1 %v1718_v52, %s1450_s0  ;;  %v280_v16 = vmin.f32 %v156_v6, %v252_v49  ;;  %v253_v21 = vsel %vm218_vm1, %v182_v33, %v183_v61  ;;  %v85_v31 = vrot.slane %v1704_v51, 7 }
  0x3e   :  { %3242 = vst [vmem:[#allocation10_spill] sm:$0xff] %v1724_v12  ;;  %v542_v20 = vsel %vm508_vm3, %v473_v11, %v474_v2  ;;  %v447_v24 = vsel %vm411_vm2, %v374_v35, %v375_v3  ;;  %673 = vrot.lane.b32.xlu0 %v1724_v12, %s1450_s0  ;;  %v279_v27 = vmin.f32 %v157_v14, %v253_v21  ;;  %v86_v33 = vrot.slane %v1732_v15, 7 }
  0x3f   :  { %v570_v26 = vmin.f32 %v446_v13, %v542_v20  ;;  %v543_v28 = vsel %vm508_vm3, %v472_v23, %v473_v11  ;;  %v328_v32 = vmin.f32 %v1694_v45, %v280_v16  ;;  %v185_v39 = vrot.slane %v1732_v15, 1 }
  0x40   :  { %v569_v34 = vmin.f32 %v447_v24, %v543_v28  ;;  %v327_v35 = vmin.f32 %v1666_v17, %v279_v27  ;;  %v186_v40 = vrot.slane %v1742_v25, 1  ;;  %v377_v19 = vrot.slane %v1704_v51, 6  ;;  %v1808_v28 = vld [vmem:[#allocation2 + $0x98] sm:$0xff] }
  0x41   :  { %v378_v43 = vrot.slane %v1732_v15, 6  ;;  %v1756_v44 = vmin.f32 %v328_v32, %v570_v26  ;;  %v154_v23 = vsel %vm121_vm0, %v85_v31, %v86_v33  ;;  %v475_v45 = vrot.slane %v1732_v15, 2 }
  0x42   :  { %v476_v46 = vrot.slane %v1742_v25, 2  ;;  %v1762_v47 = vmin.f32 %v327_v35, %v569_v34  ;;  %v250_v17 = vsel %vm218_vm1, %v185_v39, %v186_v40  ;;  %v155_v50 = vsel %vm121_vm0, %v84_v60, %v85_v31  ;;  %v1818_v35 = vld [vmem:[#allocation2 + $0xa0] sm:$0xff] }
  0x43   :  { %3243 = vst [vmem:[#allocation11_spill] sm:$0xff] %v1756_v44  ;;  %v444_v48 = vsel %vm411_vm2, %v377_v19, %v378_v43  ;;  %679 = vrot.lane.b32.xlu1 %v1756_v44, %s1450_s0  ;;  %v282_v55 = vmin.f32 %v154_v23, %v250_v17  ;;  %v251_v57 = vsel %vm218_vm1, %v184_v63, %v185_v39  ;;  %v87_v3 = vrot.slane %v1742_v25, 7 }
  0x44   :  { %3244 = vst [vmem:[#allocation12_spill] sm:$0xff] %v1762_v47  ;;  %v540_v56 = vsel %vm508_vm3, %v475_v45, %v476_v46  ;;  %v445_v58 = vsel %vm411_vm2, %v376_v4, %v377_v19  ;;  %677 = vrot.lane.b32.xlu0 %v1762_v47, %s1450_s0  ;;  %v281_v61 = vmin.f32 %v155_v50, %v251_v57  ;;  %v88_v63 = vrot.slane %v1770_v53, 7 }
  0x45   :  { %v572_v60 = vmin.f32 %v444_v48, %v540_v56  ;;  %v541_v62 = vsel %vm508_vm3, %v474_v2, %v475_v45  ;;  %v330_v6 = vmin.f32 %v1732_v15, %v282_v55  ;;  %v187_v49 = vrot.slane %v1770_v53, 1 }
  0x46   :  { %v571_v11 = vmin.f32 %v445_v58, %v541_v62  ;;  %v329_v4 = vmin.f32 %v1704_v51, %v281_v61  ;;  %v188_v13 = vrot.slane %v1780_v59, 1  ;;  %v379_v14 = vrot.slane %v1742_v25, 6 }
  0x47   :  { %v380_v16 = vrot.slane %v1770_v53, 6  ;;  %v1794_v20 = vmin.f32 %v330_v6, %v572_v60  ;;  %v152_v2 = vsel %vm121_vm0, %v87_v3, %v88_v63  ;;  %v477_v15 = vrot.slane %v1770_v53, 2  ;;  %v1846_v6 = vld [vmem:[#allocation2 + $0xa8] sm:$0xff] }
  0x48   :  { %v478_v21 = vrot.slane %v1780_v59, 2  ;;  %v1800_v24 = vmin.f32 %v329_v4, %v571_v11  ;;  %v248_v51 = vsel %vm218_vm1, %v187_v49, %v188_v13  ;;  %v153_v27 = vsel %vm121_vm0, %v86_v33, %v87_v3 }
  0x49   :  { %3245 = vst [vmem:[#allocation13_spill] sm:$0xff] %v1794_v20  ;;  %v442_v26 = vsel %vm411_vm2, %v379_v14, %v380_v16  ;;  %683 = vrot.lane.b32.xlu1 %v1794_v20, %s1450_s0  ;;  %v284_v31 = vmin.f32 %v152_v2, %v248_v51  ;;  %v249_v34 = vsel %vm218_vm1, %v186_v40, %v187_v49  ;;  %v89_v45 = vrot.slane %v1780_v59, 7  ;;  %v1856_v2 = vld [vmem:[#allocation2 + $0xb0] sm:$0xff] }
  0x4a   :  { %3246 = vst [vmem:[#allocation14_spill] sm:$0xff] %v1800_v24  ;;  %v538_v32 = vsel %vm508_vm3, %v477_v15, %v478_v21  ;;  %v443_v39 = vsel %vm411_vm2, %v378_v43, %v379_v14  ;;  %681 = vrot.lane.b32.xlu0 %v1800_v24, %s1450_s0  ;;  %v283_v19 = vmin.f32 %v153_v27, %v249_v34  ;;  %v90_v40 = vrot.slane %v1808_v28, 7 }
  0x4b   :  { %v574_v33 = vmin.f32 %v442_v26, %v538_v32  ;;  %v539_v23 = vsel %vm508_vm3, %v476_v46, %v477_v15  ;;  %v332_v17 = vmin.f32 %v1770_v53, %v284_v31  ;;  %v189_v50 = vrot.slane %v1808_v28, 1 }
  0x4c   :  { %v573_v48 = vmin.f32 %v443_v39, %v539_v23  ;;  %v331_v43 = vmin.f32 %v1742_v25, %v283_v19  ;;  %v190_v55 = vrot.slane %v1818_v35, 1  ;;  %v381_v56 = vrot.slane %v1780_v59, 6 }
  0x4d   :  { %v382_v57 = vrot.slane %v1808_v28, 6  ;;  %v1832_v58 = vmin.f32 %v332_v17, %v574_v33  ;;  %v150_v46 = vsel %vm121_vm0, %v89_v45, %v90_v40  ;;  %v479_v53 = vrot.slane %v1808_v28, 2 }
  0x4e   :  { %v480_v60 = vrot.slane %v1818_v35, 2  ;;  %v1838_v61 = vmin.f32 %v331_v43, %v573_v48  ;;  %v246_v25 = vsel %vm218_vm1, %v189_v50, %v190_v55  ;;  %v151_v3 = vsel %vm121_vm0, %v88_v63, %v89_v45 }
  0x4f   :  { %3247 = vst [vmem:[#allocation15_spill] sm:$0xff] %v1832_v58  ;;  %v440_v62 = vsel %vm411_vm2, %v381_v56, %v382_v57  ;;  %687 = vrot.lane.b32.xlu1 %v1832_v58, %s1450_s0  ;;  %v286_v11 = vmin.f32 %v150_v46, %v246_v25  ;;  %v247_v4 = vsel %vm218_vm1, %v188_v13, %v189_v50  ;;  %v91_v26 = vrot.slane %v1818_v35, 7  ;;  %v1884_v50 = vld [vmem:[#allocation2 + $0xb8] sm:$0xff]  ;;  %v1894_v25 = vld [vmem:[#allocation2 + $0xc0] sm:$0xff] }
  0x50   :  { %3248 = vst [vmem:[#allocation16_spill] sm:$0xff] %v1838_v61  ;;  %v536_v49 = vsel %vm508_vm3, %v479_v53, %v480_v60  ;;  %v441_v14 = vsel %vm411_vm2, %v380_v16, %v381_v56  ;;  %685 = vrot.lane.b32.xlu0 %v1838_v61, %s1450_s0  ;;  %v285_v15 = vmin.f32 %v151_v3, %v247_v4  ;;  %v92_v13 = vrot.slane %v1846_v6, 7 }
  0x51   :  { %v576_v63 = vmin.f32 %v440_v62, %v536_v49  ;;  %v537_v51 = vsel %vm508_vm3, %v478_v21, %v479_v53  ;;  %v334_v27 = vmin.f32 %v1808_v28, %v286_v11  ;;  %v191_v32 = vrot.slane %v1846_v6, 1 }
  0x52   :  { %v575_v31 = vmin.f32 %v441_v14, %v537_v51  ;;  %v333_v16 = vmin.f32 %v1780_v59, %v285_v15  ;;  %v192_v34 = vrot.slane %v1856_v2, 1  ;;  %v383_v39 = vrot.slane %v1818_v35, 6 }
  0x53   :  { %v384_v33 = vrot.slane %v1846_v6, 6  ;;  %v1870_v19 = vmin.f32 %v334_v27, %v576_v63  ;;  %v148_v21 = vsel %vm121_vm0, %v91_v26, %v92_v13  ;;  %v481_v28 = vrot.slane %v1846_v6, 2 }
  0x54   :  { %v482_v23 = vrot.slane %v1856_v2, 2  ;;  %v1876_v45 = vmin.f32 %v333_v16, %v575_v31  ;;  %v244_v59 = vsel %vm218_vm1, %v191_v32, %v192_v34  ;;  %v149_v48 = vsel %vm121_vm0, %v90_v40, %v91_v26 }
  0x55   :  { %3249 = vst [vmem:[#allocation17_spill] sm:$0xff] %v1870_v19  ;;  %v438_v17 = vsel %vm411_vm2, %v383_v39, %v384_v33  ;;  %691 = vrot.lane.b32.xlu1 %v1870_v19, %s1450_s0  ;;  %v288_v43 = vmin.f32 %v148_v21, %v244_v59  ;;  %v245_v46 = vsel %vm218_vm1, %v190_v55, %v191_v32  ;;  %v93_v11 = vrot.slane %v1856_v2, 7 }
  0x56   :  { %3250 = vst [vmem:[#allocation18_spill] sm:$0xff] %v1876_v45  ;;  %v534_v56 = vsel %vm508_vm3, %v481_v28, %v482_v23  ;;  %v439_v53 = vsel %vm411_vm2, %v382_v57, %v383_v39  ;;  %689 = vrot.lane.b32.xlu0 %v1876_v45, %s1450_s0  ;;  %v287_v62 = vmin.f32 %v149_v48, %v245_v46  ;;  %v94_v55 = vrot.slane %v1884_v50, 7  ;;  %v1922_v39 = vld [vmem:[#allocation2 + $0xc8] sm:$0xff]  ;;  %v1932_v48 = vld [vmem:[#allocation2 + $0xd0] sm:$0xff] }
  0x57   :  { %v578_v40 = vmin.f32 %v438_v17, %v534_v56  ;;  %v535_v3 = vsel %vm508_vm3, %v480_v60, %v481_v28  ;;  %v336_v49 = vmin.f32 %v1846_v6, %v288_v43  ;;  %v193_v14 = vrot.slane %v1884_v50, 1 }
  0x58   :  { %v577_v4 = vmin.f32 %v439_v53, %v535_v3  ;;  %v335_v57 = vmin.f32 %v1818_v35, %v287_v62  ;;  %v194_v63 = vrot.slane %v1894_v25, 1  ;;  %v385_v15 = vrot.slane %v1856_v2, 6 }
  0x59   :  { %v386_v51 = vrot.slane %v1884_v50, 6  ;;  %v1908_v26 = vmin.f32 %v336_v49, %v578_v40  ;;  %v146_v60 = vsel %vm121_vm0, %v93_v11, %v94_v55  ;;  %v483_v6 = vrot.slane %v1884_v50, 2 }
  0x5a   :  { %v484_v27 = vrot.slane %v1894_v25, 2  ;;  %v1914_v31 = vmin.f32 %v335_v57, %v577_v4  ;;  %v242_v35 = vsel %vm218_vm1, %v193_v14, %v194_v63  ;;  %v147_v16 = vsel %vm121_vm0, %v92_v13, %v93_v11 }
  0x5b   :  { %3251 = vst [vmem:[#allocation19_spill] sm:$0xff] %v1908_v26  ;;  %v436_v32 = vsel %vm411_vm2, %v385_v15, %v386_v51  ;;  %695 = vrot.lane.b32.xlu1 %v1908_v26, %s1450_s0  ;;  %v290_v21 = vmin.f32 %v146_v60, %v242_v35  ;;  %v243_v59 = vsel %vm218_vm1, %v192_v34, %v193_v14  ;;  %v95_v46 = vrot.slane %v1894_v25, 7 }
  0x5c   :  { %3252 = vst [vmem:[#allocation20_spill] sm:$0xff] %v1914_v31  ;;  %v532_v28 = vsel %vm508_vm3, %v483_v6, %v484_v27  ;;  %v437_v17 = vsel %vm411_vm2, %v384_v33, %v385_v15  ;;  %693 = vrot.lane.b32.xlu0 %v1914_v31, %s1450_s0  ;;  %v289_v43 = vmin.f32 %v147_v16, %v243_v59  ;;  %v96_v34 = vrot.slane %v1922_v39, 7 }
  0x5d   :  { %v580_v13 = vmin.f32 %v436_v32, %v532_v28  ;;  %v533_v56 = vsel %vm508_vm3, %v482_v23, %v483_v6  ;;  %v338_v53 = vmin.f32 %v1884_v50, %v290_v21  ;;  %v195_v62 = vrot.slane %v1922_v39, 1  ;;  %v1960_v6 = vld [vmem:[#allocation2 + $0xd8] sm:$0xff]  ;;  %v1970_v28 = vld [vmem:[#allocation2 + $0xe0] sm:$0xff] }
  0x5e   :  { %v579_v40 = vmin.f32 %v437_v17, %v533_v56  ;;  %v337_v33 = vmin.f32 %v1856_v2, %v289_v43  ;;  %v196_v3 = vrot.slane %v1932_v48, 1  ;;  %v387_v11 = vrot.slane %v1894_v25, 6 }
  0x5f   :  { %v388_v49 = vrot.slane %v1922_v39, 6  ;;  %v1946_v4 = vmin.f32 %v338_v53, %v580_v13  ;;  %v144_v23 = vsel %vm121_vm0, %v95_v46, %v96_v34  ;;  %v485_v50 = vrot.slane %v1922_v39, 2 }
  0x60   :  { %v486_v14 = vrot.slane %v1932_v48, 2  ;;  %v1952_v57 = vmin.f32 %v337_v33, %v579_v40  ;;  %v240_v2 = vsel %vm218_vm1, %v195_v62, %v196_v3  ;;  %v145_v60 = vsel %vm121_vm0, %v94_v55, %v95_v46 }
  0x61   :  { %3253 = vst [vmem:[#allocation21_spill] sm:$0xff] %v1946_v4  ;;  %v434_v15 = vsel %vm411_vm2, %v387_v11, %v388_v49  ;;  %699 = vrot.lane.b32.xlu1 %v1946_v4, %s1450_s0  ;;  %v292_v35 = vmin.f32 %v144_v23, %v240_v2  ;;  %v241_v16 = vsel %vm218_vm1, %v194_v63, %v195_v62  ;;  %v97_v13 = vrot.slane %v1932_v48, 7 }
  0x62   :  { %3254 = vst [vmem:[#allocation22_spill] sm:$0xff] %v1952_v57  ;;  %v530_v32 = vsel %vm508_vm3, %v485_v50, %v486_v14  ;;  %v435_v21 = vsel %vm411_vm2, %v386_v51, %v387_v11  ;;  %697 = vrot.lane.b32.xlu0 %v1952_v57, %s1450_s0  ;;  %v291_v59 = vmin.f32 %v145_v60, %v241_v16  ;;  %v98_v63 = vrot.slane %v1960_v6, 7 }
  0x63   :  { %v582_v55 = vmin.f32 %v434_v15, %v530_v32  ;;  %v531_v17 = vsel %vm508_vm3, %v484_v27, %v485_v50  ;;  %v340_v43 = vmin.f32 %v1922_v39, %v292_v35  ;;  %v197_v46 = vrot.slane %v1960_v6, 1  ;;  %v1998_v15 = vld [vmem:[#allocation2 + $0xe8] sm:$0xff] }
  0x64   :  { %v581_v56 = vmin.f32 %v435_v21, %v531_v17  ;;  %v339_v51 = vmin.f32 %v1894_v25, %v291_v59  ;;  %v198_v53 = vrot.slane %v1970_v28, 1  ;;  %v389_v40 = vrot.slane %v1932_v48, 6  ;;  %v2008_v21 = vld [vmem:[#allocation2 + $0xf0] sm:$0xff] }
  0x65   :  { %v390_v62 = vrot.slane %v1960_v6, 6  ;;  %v1984_v33 = vmin.f32 %v340_v43, %v582_v55  ;;  %v142_v27 = vsel %vm121_vm0, %v97_v13, %v98_v63  ;;  %v487_v39 = vrot.slane %v1960_v6, 2 }
  0x66   :  { %v488_v11 = vrot.slane %v1970_v28, 2  ;;  %v1990_v23 = vmin.f32 %v339_v51, %v581_v56  ;;  %v238_v25 = vsel %vm218_vm1, %v197_v46, %v198_v53  ;;  %v143_v2 = vsel %vm121_vm0, %v96_v34, %v97_v13 }
  0x67   :  { %3255 = vst [vmem:[#allocation23_spill] sm:$0xff] %v1984_v33  ;;  %v432_v50 = vsel %vm411_vm2, %v389_v40, %v390_v62  ;;  %703 = vrot.lane.b32.xlu1 %v1984_v33, %s1450_s0  ;;  %v294_v60 = vmin.f32 %v142_v27, %v238_v25  ;;  %v239_v32 = vsel %vm218_vm1, %v196_v3, %v197_v46  ;;  %v99_v17 = vrot.slane %v1970_v28, 7 }
  0x68   :  { %3256 = vst [vmem:[#allocation24_spill] sm:$0xff] %v1990_v23  ;;  %v528_v35 = vsel %vm508_vm3, %v487_v39, %v488_v11  ;;  %v433_v16 = vsel %vm411_vm2, %v388_v49, %v389_v40  ;;  %701 = vrot.lane.b32.xlu0 %v1990_v23, %s1450_s0  ;;  %v293_v55 = vmin.f32 %v143_v2, %v239_v32  ;;  %v100_v3 = vrot.slane %v1998_v15, 7 }
  0x69   :  { %v584_v34 = vmin.f32 %v432_v50, %v528_v35  ;;  %v529_v59 = vsel %vm508_vm3, %v486_v14, %v487_v39  ;;  %v342_v13 = vmin.f32 %v1960_v6, %v294_v60  ;;  %v199_v56 = vrot.slane %v1998_v15, 1  ;;  %v2036_v60 = vld [vmem:[#allocation2 + $0xf8] sm:$0xff] }
  0x6a   :  { %v583_v43 = vmin.f32 %v433_v16, %v529_v59  ;;  %v341_v49 = vmin.f32 %v1932_v48, %v293_v55  ;;  %v200_v46 = vrot.slane %v2008_v21, 1  ;;  %v391_v51 = vrot.slane %v1970_v28, 6  ;;  %v2046_v55 = vld [vmem:[#allocation2 + $0x100] sm:$0xff] }
  0x6b   :  { %v392_v40 = vrot.slane %v1998_v15, 6  ;;  %v2022_v27 = vmin.f32 %v342_v13, %v584_v34  ;;  %v140_v14 = vsel %vm121_vm0, %v99_v17, %v100_v3  ;;  %v489_v6 = vrot.slane %v1998_v15, 2 }
  0x6c   :  { %v490_v39 = vrot.slane %v2008_v21, 2  ;;  %v2028_v25 = vmin.f32 %v341_v49, %v583_v43  ;;  %v236_v48 = vsel %vm218_vm1, %v199_v56, %v200_v46  ;;  %v141_v2 = vsel %vm121_vm0, %v98_v63, %v99_v17 }
  0x6d   :  { %3257 = vst [vmem:[#allocation25_spill] sm:$0xff] %v2022_v27  ;;  %v430_v50 = vsel %vm411_vm2, %v391_v51, %v392_v40  ;;  %707 = vrot.lane.b32.xlu1 %v2022_v27, %s1450_s0  ;;  %v296_v35 = vmin.f32 %v140_v14, %v236_v48  ;;  %v237_v16 = vsel %vm218_vm1, %v198_v53, %v199_v56  ;;  %v101_v13 = vrot.slane %v2008_v21, 7 }
  0x6e   :  { %3258 = vst [vmem:[#allocation26_spill] sm:$0xff] %v2028_v25  ;;  %v526_v32 = vsel %vm508_vm3, %v489_v6, %v490_v39  ;;  %v431_v34 = vsel %vm411_vm2, %v390_v62, %v391_v51  ;;  %705 = vrot.lane.b32.xlu0 %v2028_v25, %s1450_s0  ;;  %v295_v59 = vmin.f32 %v141_v2, %v237_v16  ;;  %v102_v53 = vrot.slane %v2036_v60, 7  ;;  %v2074_v16 = vld [vmem:[#allocation2 + $0x108] sm:$0xff] }
  0x6f   :  { %v586_v63 = vmin.f32 %v430_v50, %v526_v32  ;;  %v527_v17 = vsel %vm508_vm3, %v488_v11, %v489_v6  ;;  %v344_v43 = vmin.f32 %v1998_v15, %v296_v35  ;;  %v201_v56 = vrot.slane %v2036_v60, 1 }
  0x70   :  { %v585_v49 = vmin.f32 %v431_v34, %v527_v17  ;;  %v343_v62 = vmin.f32 %v1970_v28, %v295_v59  ;;  %v202_v51 = vrot.slane %v2046_v55, 1  ;;  %v393_v14 = vrot.slane %v2008_v21, 6 }
  0x71   :  { %v394_v48 = vrot.slane %v2036_v60, 6  ;;  %v2060_v50 = vmin.f32 %v344_v43, %v586_v63  ;;  %v138_v11 = vsel %vm121_vm0, %v101_v13, %v102_v53  ;;  %v491_v15 = vrot.slane %v2036_v60, 2  ;;  %v2084_v43 = vld [vmem:[#allocation2 + $0x110] sm:$0xff] }
  0x72   :  { %v492_v6 = vrot.slane %v2046_v55, 2  ;;  %v2066_v2 = vmin.f32 %v343_v62, %v585_v49  ;;  %v234_v28 = vsel %vm218_vm1, %v201_v56, %v202_v51  ;;  %v139_v32 = vsel %vm121_vm0, %v100_v3, %v101_v13 }
  0x73   :  { %3259 = vst [vmem:[#allocation27_spill] sm:$0xff] %v2060_v50  ;;  %v428_v35 = vsel %vm411_vm2, %v393_v14, %v394_v48  ;;  %711 = vrot.lane.b32.xlu1 %v2060_v50, %s1450_s0  ;;  %v298_v34 = vmin.f32 %v138_v11, %v234_v28  ;;  %v235_v59 = vsel %vm218_vm1, %v200_v46, %v201_v56  ;;  %v103_v62 = vrot.slane %v2046_v55, 7 }
  0x74   :  { %3260 = vst [vmem:[#allocation28_spill] sm:$0xff] %v2066_v2  ;;  %v524_v63 = vsel %vm508_vm3, %v491_v15, %v492_v6  ;;  %v429_v17 = vsel %vm411_vm2, %v392_v40, %v393_v14  ;;  %709 = vrot.lane.b32.xlu0 %v2066_v2, %s1450_s0  ;;  %v297_v13 = vmin.f32 %v139_v32, %v235_v59  ;;  %v104_v46 = vrot.slane %v2074_v16, 7 }
  0x75   :  { %v588_v3 = vmin.f32 %v428_v35, %v524_v63  ;;  %v525_v49 = vsel %vm508_vm3, %v490_v39, %v491_v15  ;;  %v346_v11 = vmin.f32 %v2036_v60, %v298_v34  ;;  %v203_v56 = vrot.slane %v2074_v16, 1 }
  0x76   :  { %v587_v28 = vmin.f32 %v429_v17, %v525_v49  ;;  %v345_v40 = vmin.f32 %v2008_v21, %v297_v13  ;;  %v204_v14 = vrot.slane %v2084_v43, 1  ;;  %v395_v30 = vrot.slane %v2046_v55, 6  ;;  %v2112_v17 = vld [vmem:[#allocation2 + $0x118] sm:$0xff] }
  0x77   :  { %v396_v35 = vrot.slane %v2074_v16, 6  ;;  %v2098_v32 = vmin.f32 %v346_v11, %v588_v3  ;;  %v136_v39 = vsel %vm121_vm0, %v103_v62, %v104_v46  ;;  %v493_v60 = vrot.slane %v2074_v16, 2 }
  0x78   :  { %v494_v15 = vrot.slane %v2084_v43, 2  ;;  %v2104_v34 = vmin.f32 %v345_v40, %v587_v28  ;;  %v232_v21 = vsel %vm218_vm1, %v203_v56, %v204_v14  ;;  %v137_v59 = vsel %vm121_vm0, %v102_v53, %v103_v62  ;;  %v2122_v28 = vld [vmem:[#allocation2 + $0x120] sm:$0xff] }
  0x79   :  { %3261 = vst [vmem:[#allocation29_spill] sm:$0xff] %v2098_v32  ;;  %v426_v63 = vsel %vm411_vm2, %v395_v30, %v396_v35  ;;  %715 = vrot.lane.b32.xlu1 %v2098_v32, %s1450_s0  ;;  %v300_v3 = vmin.f32 %v136_v39, %v232_v21  ;;  %v233_v49 = vsel %vm218_vm1, %v202_v51, %v203_v56  ;;  %v105_v39 = vrot.slane %v2084_v43, 7 }
  0x7a   :  { %3262 = vst [vmem:[#allocation30_spill] sm:$0xff] %v2104_v34  ;;  %v522_v13 = vsel %vm508_vm3, %v493_v60, %v494_v15  ;;  %v427_v11 = vsel %vm411_vm2, %v394_v48, %v395_v30  ;;  %713 = vrot.lane.b32.xlu0 %v2104_v34, %s1450_s0  ;;  %v299_v62 = vmin.f32 %v137_v59, %v233_v49  ;;  %v106_v51 = vrot.slane %v2112_v17, 7 }
  0x7b   :  { %v590_v53 = vmin.f32 %v426_v63, %v522_v13  ;;  %v523_v40 = vsel %vm508_vm3, %v492_v6, %v493_v60  ;;  %v348_v21 = vmin.f32 %v2074_v16, %v300_v3  ;;  %v205_v56 = vrot.slane %v2112_v17, 1 }
  0x7c   :  { %v589_v29 = vmin.f32 %v427_v11, %v523_v40  ;;  %v347_v30 = vmin.f32 %v2046_v55, %v299_v62  ;;  %v206_v48 = vrot.slane %v2122_v28, 1  ;;  %v397_v22 = vrot.slane %v2084_v43, 6  ;;  %v2150_v11 = vld [vmem:[#allocation2 + $0x128] sm:$0xff] }
  0x7d   :  { %v398_v63 = vrot.slane %v2112_v17, 6  ;;  %v2136_v59 = vmin.f32 %v348_v21, %v590_v53  ;;  %v134_v6 = vsel %vm121_vm0, %v105_v39, %v106_v51  ;;  %v495_v16 = vrot.slane %v2112_v17, 2  ;;  %v2160_v21 = vld [vmem:[#allocation2 + $0x130] sm:$0xff] }
  0x7e   :  { %v496_v60 = vrot.slane %v2122_v28, 2  ;;  %v2142_v3 = vmin.f32 %v347_v30, %v589_v29  ;;  %v230_v55 = vsel %vm218_vm1, %v205_v56, %v206_v48  ;;  %v135_v49 = vsel %vm121_vm0, %v104_v46, %v105_v39 }
  0x7f   :  { %3263 = vst [vmem:[#allocation31_spill] sm:$0xff] %v2136_v59  ;;  %v424_v13 = vsel %vm411_vm2, %v397_v22, %v398_v63  ;;  %719 = vrot.lane.b32.xlu1 %v2136_v59, %s1450_s0  ;;  %v302_v53 = vmin.f32 %v134_v6, %v230_v55  ;;  %v231_v29 = vsel %vm218_vm1, %v204_v14, %v205_v56  ;;  %v107_v6 = vrot.slane %v2122_v28, 7 }
  0x80   :  { %3264 = vst [vmem:[#allocation32_spill] sm:$0xff] %v2142_v3  ;;  %v520_v62 = vsel %vm508_vm3, %v495_v16, %v496_v60  ;;  %v425_v40 = vsel %vm411_vm2, %v396_v35, %v397_v22  ;;  %717 = vrot.lane.b32.xlu0 %v2142_v3, %s1450_s0  ;;  %v301_v39 = vmin.f32 %v135_v49, %v231_v29  ;;  %v108_v14 = vrot.slane %v2150_v11, 7 }
  0x81   :  { %v592_v46 = vmin.f32 %v424_v13, %v520_v62  ;;  %v521_v30 = vsel %vm508_vm3, %v494_v15, %v495_v16  ;;  %v350_v55 = vmin.f32 %v2112_v17, %v302_v53  ;;  %v207_v56 = vrot.slane %v2150_v11, 1 }
  0x82   :  { %v591_v18 = vmin.f32 %v425_v40, %v521_v30  ;;  %v349_v22 = vmin.f32 %v2084_v43, %v301_v39  ;;  %v208_v35 = vrot.slane %v2160_v21, 1  ;;  %v399_v3 = vrot.slane %v2122_v28, 6  ;;  %v2188_v40 = vld [vmem:[#allocation2 + $0x138] sm:$0xff] }
  0x83   :  { %v400_v13 = vrot.slane %v2150_v11, 6  ;;  %v2174_v49 = vmin.f32 %v350_v55, %v592_v46  ;;  %v132_v15 = vsel %vm121_vm0, %v107_v6, %v108_v14  ;;  %v497_v17 = vrot.slane %v2150_v11, 2  ;;  %v2198_v55 = vld [vmem:[#allocation2 + $0x140] sm:$0xff] }
  0x84   :  { %v498_v16 = vrot.slane %v2160_v21, 2  ;;  %v2180_v53 = vmin.f32 %v349_v22, %v591_v18  ;;  %v228_v43 = vsel %vm218_vm1, %v207_v56, %v208_v35  ;;  %v133_v29 = vsel %vm121_vm0, %v106_v51, %v107_v6 }
  0x85   :  { %3265 = vst [vmem:[#allocation33_spill] sm:$0xff] %v2174_v49  ;;  %v422_v62 = vsel %vm411_vm2, %v399_v3, %v400_v13  ;;  %723 = vrot.lane.b32.xlu1 %v2174_v49, %s1450_s0  ;;  %v304_v46 = vmin.f32 %v132_v15, %v228_v43  ;;  %v229_v18 = vsel %vm218_vm1, %v206_v48, %v207_v56  ;;  %v109_v15 = vrot.slane %v2160_v21, 7 }
  0x86   :  { %3266 = vst [vmem:[#allocation34_spill] sm:$0xff] %v2180_v53  ;;  %v518_v39 = vsel %vm508_vm3, %v497_v17, %v498_v16  ;;  %v423_v30 = vsel %vm411_vm2, %v398_v63, %v399_v3  ;;  %721 = vrot.lane.b32.xlu0 %v2180_v53, %s1450_s0  ;;  %v303_v6 = vmin.f32 %v133_v29, %v229_v18  ;;  %v110_v48 = vrot.slane %v2188_v40, 7 }
  0x87   :  { %v594_v51 = vmin.f32 %v422_v62, %v518_v39  ;;  %v519_v22 = vsel %vm508_vm3, %v496_v60, %v497_v17  ;;  %v352_v43 = vmin.f32 %v2150_v11, %v304_v46  ;;  %v209_v56 = vrot.slane %v2188_v40, 1 }
  0x88   :  { %v593_v49 = vmin.f32 %v423_v30, %v519_v22  ;;  %v351_v63 = vmin.f32 %v2122_v28, %v303_v6  ;;  %v210_v3 = vrot.slane %v2198_v55, 1  ;;  %v401_v53 = vrot.slane %v2160_v21, 6  ;;  %v2226_v30 = vld [vmem:[#allocation2 + $0x148] sm:$0xff] }
  0x89   :  { %v402_v62 = vrot.slane %v2188_v40, 6  ;;  %v2212_v29 = vmin.f32 %v352_v43, %v594_v51  ;;  %v130_v60 = vsel %vm121_vm0, %v109_v15, %v110_v48  ;;  %v499_v11 = vrot.slane %v2188_v40, 2  ;;  %v2236_v43 = vld [vmem:[#allocation2 + $0x150] sm:$0xff] }
  0x8a   :  { %v500_v17 = vrot.slane %v2198_v55, 2  ;;  %v2218_v46 = vmin.f32 %v351_v63, %v593_v49  ;;  %v226_v28 = vsel %vm218_vm1, %v209_v56, %v210_v3  ;;  %v131_v18 = vsel %vm121_vm0, %v108_v14, %v109_v15 }
  0x8b   :  { %3267 = vst [vmem:[#allocation35_spill] sm:$0xff] %v2212_v29  ;;  %v420_v39 = vsel %vm411_vm2, %v401_v53, %v402_v62  ;;  %727 = vrot.lane.b32.xlu1 %v2212_v29, %s1450_s0  ;;  %v306_v51 = vmin.f32 %v130_v60, %v226_v28  ;;  %v227_v49 = vsel %vm218_vm1, %v208_v35, %v209_v56  ;;  %v111_v60 = vrot.slane %v2198_v55, 7 }
  0x8c   :  { %3268 = vst [vmem:[#allocation36_spill] sm:$0xff] %v2218_v46  ;;  %v516_v6 = vsel %vm508_vm3, %v499_v11, %v500_v17  ;;  %v421_v22 = vsel %vm411_vm2, %v400_v13, %v401_v53  ;;  %725 = vrot.lane.b32.xlu0 %v2218_v46, %s1450_s0  ;;  %v305_v15 = vmin.f32 %v131_v18, %v227_v49  ;;  %v112_v35 = vrot.slane %v2226_v30, 7 }
  0x8d   :  { %v596_v14 = vmin.f32 %v420_v39, %v516_v6  ;;  %v517_v63 = vsel %vm508_vm3, %v498_v16, %v499_v11  ;;  %v354_v28 = vmin.f32 %v2188_v40, %v306_v51  ;;  %v211_v56 = vrot.slane %v2226_v30, 1 }
  0x8e   :  { %v595_v29 = vmin.f32 %v421_v22, %v517_v63  ;;  %v353_v13 = vmin.f32 %v2160_v21, %v305_v15  ;;  %v212_v53 = vrot.slane %v2236_v43, 1  ;;  %v403_v46 = vrot.slane %v2198_v55, 6  ;;  %v2264_v22 = vld [vmem:[#allocation2 + $0x158] sm:$0xff] }
  0x8f   :  { %v404_v39 = vrot.slane %v2226_v30, 6  ;;  %v2250_v18 = vmin.f32 %v354_v28, %v596_v14  ;;  %v128_v16 = vsel %vm121_vm0, %v111_v60, %v112_v35  ;;  %v501_v40 = vrot.slane %v2226_v30, 2  ;;  %v2274_v28 = vld [vmem:[#allocation2 + $0x160] sm:$0xff] }
  0x90   :  { %v502_v11 = vrot.slane %v2236_v43, 2  ;;  %v2256_v51 = vmin.f32 %v353_v13, %v595_v29  ;;  %v224_v21 = vsel %vm218_vm1, %v211_v56, %v212_v53  ;;  %v129_v49 = vsel %vm121_vm0, %v110_v48, %v111_v60 }
  0x91   :  { %3269 = vst [vmem:[#allocation37_spill] sm:$0xff] %v2250_v18  ;;  %v418_v6 = vsel %vm411_vm2, %v403_v46, %v404_v39  ;;  %731 = vrot.lane.b32.xlu1 %v2250_v18, %s1450_s0  ;;  %v308_v14 = vmin.f32 %v128_v16, %v224_v21  ;;  %v225_v29 = vsel %vm218_vm1, %v210_v3, %v211_v56  ;;  %v2276_v13 = vpop.permute.xlu1 %657  ;;  %v113_v21 = vrot.slane %v2236_v43, 7 }
  0x92   :  { %3270 = vst [vmem:[#allocation38_spill] sm:$0xff] %v2256_v51  ;;  %v514_v15 = vsel %vm508_vm3, %v501_v40, %v502_v11  ;;  %v419_v63 = vsel %vm411_vm2, %v402_v62, %v403_v46  ;;  %3271 = vst [vmem:[#allocation39_spill] sm:$0xff] %v2276_v13  ;;  %729 = vrot.lane.b32.xlu0 %v2256_v51, %s1450_s0  ;;  %v307_v60 = vmin.f32 %v129_v49, %v225_v29 }
  0x93   :  { %v598_v48 = vmin.f32 %v418_v6, %v514_v15  ;;  %v515_v16 = vsel %vm508_vm3, %v500_v17, %v501_v40  ;;  %v356_v18 = vmin.f32 %v2226_v30, %v308_v14  ;;  %v114_v56 = vrot.slane %v2264_v22, 7 }
  0x94   :  { %v597_v3 = vmin.f32 %v419_v63, %v515_v16  ;;  %v213_v62 = vrot.slane %v2264_v22, 1  ;;  %v355_v46 = vmin.f32 %v2198_v55, %v307_v60  ;;  %v214_v13 = vrot.slane %v2274_v28, 1  ;;  %v2290_v49 = vpop.permute.xlu0 %653 }
  0x95   :  { %v405_v51 = vrot.slane %v2236_v43, 6  ;;  %v406_v6 = vrot.slane %v2264_v22, 6  ;;  %3272 = vst [vmem:[#allocation40_spill] sm:$0xff] %v2290_v49  ;;  %v2292_v17 = vmin.f32 %v356_v18, %v598_v48  ;;  %v126_v30 = vsel %vm121_vm0, %v113_v21, %v114_v56  ;;  %v2306_v18 = vld [vmem:[#allocation2 + $0x168] sm:$0xff] }
  0x96   :  { %v503_v40 = vrot.slane %v2264_v22, 2  ;;  %v504_v14 = vrot.slane %v2274_v28, 2  ;;  %v2298_v15 = vmin.f32 %v355_v46, %v597_v3  ;;  %v222_v55 = vsel %vm218_vm1, %v213_v62, %v214_v13  ;;  %v69_v46 = vld [vmem:[#allocation2 + $0x170] sm:$0xff] }
  0x97   :  { %3273 = vst [vmem:[#allocation41_spill] sm:$0xff] %v2292_v17  ;;  %v416_v29 = vsel %vm411_vm2, %v405_v51, %v406_v6  ;;  %v127_v63 = vsel %vm121_vm0, %v112_v35, %v113_v21  ;;  %735 = vrot.lane.b32.xlu1 %v2292_v17, %s1450_s0  ;;  %v310_v48 = vmin.f32 %v126_v30, %v222_v55  ;;  %v2316_v49 = vpop.permute.xlu1 %659  ;;  %v115_v55 = vrot.slane %v2274_v28, 7 }
  0x98   :  { %3274 = vst [vmem:[#allocation42_spill] sm:$0xff] %v2298_v15  ;;  %v512_v60 = vsel %vm508_vm3, %v503_v40, %v504_v14  ;;  %v223_v16 = vsel %vm218_vm1, %v212_v53, %v213_v62  ;;  %v417_v3 = vsel %vm411_vm2, %v404_v39, %v405_v51  ;;  %3275 = vst [vmem:[#allocation43_spill] sm:$0xff] %v2316_v49  ;;  %733 = vrot.lane.b32.xlu0 %v2298_v15, %s1450_s0 }
  0x99   :  { %v600_v35 = vmin.f32 %v416_v29, %v512_v60  ;;  %v309_v21 = vmin.f32 %v127_v63, %v223_v16  ;;  %v513_v30 = vsel %vm508_vm3, %v502_v11, %v503_v40  ;;  %v2323_v17 = vpop.permute.xlu0 %655  ;;  %v358_v53 = vmin.f32 %v2264_v22, %v310_v48 }
  0x9a   :  { %3276 = vst [vmem:[#allocation44_spill] sm:$0xff] %v2323_v17  ;;  %v599_v62 = vmin.f32 %v417_v3, %v513_v30  ;;  %v116_v39 = vrot.slane %v2306_v18, 7  ;;  %v215_v51 = vrot.slane %v2306_v18, 1  ;;  %v216_v59 = vrot.slane %v69_v46, 1 }
  0x9b   :  { %v357_v49 = vmin.f32 %v2236_v43, %v309_v21  ;;  %v407_v29 = vrot.slane %v2274_v28, 6  ;;  %v408_v63 = vrot.slane %v2306_v18, 6  ;;  %v2331_v60 = vmin.f32 %v358_v53, %v600_v35 }
  0x9c   :  { %v124_v11 = vsel %vm121_vm0, %v115_v55, %v116_v39  ;;  %v505_v40 = vrot.slane %v2306_v18, 2  ;;  %v506_v22 = vrot.slane %v69_v46, 2  ;;  %v220_v16 = vsel %vm218_vm1, %v215_v51, %v216_v59 }
  0x9d   :  { %3277 = vst [vmem:[#allocation45_spill] sm:$0xff] %v2331_v60  ;;  %v2336_v48 = vmin.f32 %v357_v49, %v599_v62  ;;  %v414_v43 = vsel %vm411_vm2, %v407_v29, %v408_v63  ;;  %v125_v3 = vsel %vm121_vm0, %v114_v56, %v115_v55  ;;  %739 = vrot.lane.b32.xlu1 %v2331_v60, %s1450_s0  ;;  %v2352_v53 = vpop.permute.xlu1 %663  ;;  %v409_v15 = vrot.slane %v69_v46, 6 }
  0x9e   :  { %v312_v35 = vmin.f32 %v124_v11, %v220_v16  ;;  %v510_v21 = vsel %vm508_vm3, %v505_v40, %v506_v22  ;;  %v221_v49 = vsel %vm218_vm1, %v214_v13, %v215_v51  ;;  %v415_v30 = vsel %vm411_vm2, %v406_v6, %v407_v29  ;;  %v2358_v16 = vpop.permute.xlu0 %661  ;;  %v1350_v13 = vld [vmem:[#allocation2 + $0x178] sm:$0xff] }
  0x9f   :  { %3278 = vst [vmem:[#allocation46_spill] sm:$0xff] %v2336_v48  ;;  %737 = vrot.lane.b32.xlu0 %v2336_v48, %s1450_s0  ;;  %v602_v62 = vmin.f32 %v414_v43, %v510_v21  ;;  %v311_v56 = vmin.f32 %v125_v3, %v221_v49  ;;  %v511_v55 = vsel %vm508_vm3, %v504_v14, %v505_v40  ;;  %v117_v11 = vrot.slane %v69_v46, 7 }
  0xa0   :  { %v360_v17 = vmin.f32 %v2306_v18, %v312_v35  ;;  %v601_v60 = vmin.f32 %v415_v30, %v511_v55  ;;  %v217_v51 = vrot.slane %v1350_v13, 1  ;;  %v3279_v29 = vrot.slane %v1494_v10, 7 }
  0xa1   :  { %v359_v6 = vmin.f32 %v2274_v28, %v311_v56  ;;  %v507_v3 = vrot.slane %v1350_v13, 2  ;;  %v123_v14 = vsel %vm121_vm0, %v116_v39, %v117_v11  ;;  %v3281_v21 = vrot.slane %v1492_v9, 1 }
  0xa2   :  { %v122_v43 = vsel %vm121_vm0, %v117_v11, %v3279_v29  ;;  %v2368_v40 = vmin.f32 %v360_v17, %v602_v62  ;;  %v3282_v35 = vrot.slane %v1494_v10, 6  ;;  %v219_v49 = vsel %vm218_vm1, %v216_v59, %v217_v51 }
  0xa3   :  { %v266_v18 = vsel %vm218_vm1, %v217_v51, %v3281_v21  ;;  %v2380_v30 = vmin.f32 %v359_v6, %v601_v60  ;;  %v3284_v39 = vrot.slane %v1492_v9, 2  ;;  %v313_v62 = vmin.f32 %v123_v14, %v219_v49  ;;  %v2392_v59 = vpop.permute.xlu1 %667 }
  0xa4   :  { %3280 = vst [vmem:[#allocation47_spill] sm:$0xff] %v2368_v40  ;;  %v412_v28 = vsel %vm411_vm2, %v409_v15, %v3282_v35  ;;  %v314_v56 = vmin.f32 %v122_v43, %v266_v18  ;;  %743 = vrot.lane.b32.xlu1 %v2368_v40, %s1450_s0  ;;  %v413_v10 = vsel %vm411_vm2, %v408_v63, %v409_v15  ;;  %v2396_v6 = vpop.permute.xlu0 %665 }
  0xa5   :  { %3283 = vst [vmem:[#allocation48_spill] sm:$0xff] %v2380_v30  ;;  %v556_v17 = vsel %vm508_vm3, %v507_v3, %v3284_v39  ;;  %v509_v11 = vsel %vm508_vm3, %v506_v22, %v507_v3  ;;  %741 = vrot.lane.b32.xlu0 %v2380_v30, %s1450_s0  ;;  %v361_v60 = vmin.f32 %v69_v46, %v313_v62  ;;  %3285 = vst [vmem:[#allocation49_spill] sm:$0xff] %v2396_v6 }
  0xa6   :  { %v604_v55 = vmin.f32 %v412_v28, %v556_v17  ;;  %v362_v9 = vmin.f32 %v1350_v13, %v314_v56  ;;  %v603_v51 = vmin.f32 %v413_v10, %v509_v11 }
  0xa8   :  { %v2398_v29 = vmin.f32 %v362_v9, %v604_v55  ;;  %v2400_v43 = vmin.f32 %v361_v60, %v603_v51 }
  0xa9   :  { %v2406_v1 = vpop.permute.xlu1 %671 }
  0xaa   :  { %3286 = vst [vmem:[#allocation50_spill] sm:$0xff] %v2398_v29  ;;  %3287 = vst [vmem:[#allocation51_spill] sm:$0xff] %v2400_v43  ;;  %747 = vrot.lane.b32.xlu1 %v2398_v29, %s1450_s0  ;;  %745 = vrot.lane.b32.xlu0 %v2400_v43, %s1450_s0  ;;  %v2408_v15 = vpop.permute.xlu0 %669 }
  0xab   :  { %3288 = vst [vmem:[#allocation52_spill] sm:$0xff] %v2406_v1  ;;  %3289 = vst [vmem:[#allocation53_spill] sm:$0xff] %v2408_v15 }
  0xae   :  { %751 = vrot.lane.b32.xlu1 %v1573_v8, %s1451_s20  ;;  %749 = vrot.lane.b32.xlu0 %v1558_v54, %s1451_s20 }
  0xaf   :  { %v2414_v46 = vpop.permute.xlu1 %675 }
  0xb0   :  { %3290 = vst [vmem:[#allocation54_spill] sm:$0xff] %v2414_v46  ;;  %v2420_v63 = vpop.permute.xlu0 %673 }
  0xb1   :  { %3291 = vst [vmem:[#allocation55_spill] sm:$0xff] %v2420_v63 }
  0xb2   :  { %755 = vrot.lane.b32.xlu1 %v1568_v5, %s1451_s20  ;;  %753 = vrot.lane.b32.xlu0 %v1527_v36, %s1451_s20 }
  0xb5   :  { %v2426_v22 = vpop.permute.xlu1 %679 }
  0xb6   :  { %759 = vrot.lane.b32.xlu1 %v1604_v37, %s1451_s20  ;;  %757 = vrot.lane.b32.xlu0 %v1610_v41, %s1451_s20  ;;  %3292 = vst [vmem:[#allocation56_spill] sm:$0xff] %v2426_v22  ;;  %v2428_v13 = vpop.permute.xlu0 %677 }
  0xb7   :  { %3293 = vst [vmem:[#allocation57_spill] sm:$0xff] %v2428_v13 }
  0xba   :  { %763 = vrot.lane.b32.xlu1 %v1642_v0, %s1451_s20  ;;  %761 = vrot.lane.b32.xlu0 %v1648_v7, %s1451_s20 }
  0xbb   :  { %v2434_v3 = vpop.permute.xlu1 %683 }
  0xbc   :  { %3294 = vst [vmem:[#allocation58_spill] sm:$0xff] %v2434_v3  ;;  %v2440_v14 = vpop.permute.xlu0 %681 }
  0xbd   :  { %3295 = vst [vmem:[#allocation59_spill] sm:$0xff] %v2440_v14 }
  0xbe   :  { %767 = vrot.lane.b32.xlu1 %v1680_v38, %s1451_s20  ;;  %765 = vrot.lane.b32.xlu0 %v1686_v42, %s1451_s20 }
  0xc1   :  { %v2446_v21 = vpop.permute.xlu1 %687 }
  0xc2   :  { %771 = vrot.lane.b32.xlu1 %v1718_v52, %s1451_s20  ;;  %769 = vrot.lane.b32.xlu0 %v1724_v12, %s1451_s20  ;;  %3296 = vst [vmem:[#allocation60_spill] sm:$0xff] %v2446_v21  ;;  %v2448_v18 = vpop.permute.xlu0 %685 }
  0xc3   :  { %3297 = vst [vmem:[#allocation61_spill] sm:$0xff] %v2448_v18 }
  0xc6   :  { %775 = vrot.lane.b32.xlu1 %v1756_v44, %s1451_s20  ;;  %773 = vrot.lane.b32.xlu0 %v1762_v47, %s1451_s20 }
  0xc7   :  { %v2454_v35 = vpop.permute.xlu1 %691 }
  0xc8   :  { %3298 = vst [vmem:[#allocation62_spill] sm:$0xff] %v2454_v35  ;;  %v2460_v28 = vpop.permute.xlu0 %689 }
  0xc9   :  { %3299 = vst [vmem:[#allocation63_spill] sm:$0xff] %v2460_v28 }
  0xca   :  { %779 = vrot.lane.b32.xlu1 %v1794_v20, %s1451_s20  ;;  %777 = vrot.lane.b32.xlu0 %v1800_v24, %s1451_s20 }
  0xcd   :  { %v2466_v49 = vpop.permute.xlu1 %695 }
  0xce   :  { %783 = vrot.lane.b32.xlu1 %v1832_v58, %s1451_s20  ;;  %781 = vrot.lane.b32.xlu0 %v1838_v61, %s1451_s20  ;;  %3300 = vst [vmem:[#allocation64_spill] sm:$0xff] %v2466_v49  ;;  %v2468_v56 = vpop.permute.xlu0 %693  ;;  %v3322_v49 = vld [vmem:[#allocation38_spill] sm:$0xff] }
  0xcf   :  { %3301 = vst [vmem:[#allocation65_spill] sm:$0xff] %v2468_v56 }
  0xd2   :  { %787 = vrot.lane.b32.xlu1 %v1870_v19, %s1451_s20  ;;  %785 = vrot.lane.b32.xlu0 %v1876_v45, %s1451_s20 }
  0xd3   :  { %v2474_v39 = vpop.permute.xlu1 %699 }
  0xd4   :  { %3302 = vst [vmem:[#allocation66_spill] sm:$0xff] %v2474_v39  ;;  %v2480_v17 = vpop.permute.xlu0 %697  ;;  %v3319_v39 = vld [vmem:[#allocation36_spill] sm:$0xff] }
  0xd5   :  { %3303 = vst [vmem:[#allocation67_spill] sm:$0xff] %v2480_v17 }
  0xd6   :  { %791 = vrot.lane.b32.xlu1 %v1908_v26, %s1451_s20  ;;  %789 = vrot.lane.b32.xlu0 %v1914_v31, %s1451_s20 }
  0xd9   :  { %v2486_v62 = vpop.permute.xlu1 %703 }
  0xda   :  { %795 = vrot.lane.b32.xlu1 %v1946_v4, %s1451_s20  ;;  %793 = vrot.lane.b32.xlu0 %v1952_v57, %s1451_s20  ;;  %3304 = vst [vmem:[#allocation68_spill] sm:$0xff] %v2486_v62  ;;  %v2488_v55 = vpop.permute.xlu0 %701 }
  0xdb   :  { %3305 = vst [vmem:[#allocation69_spill] sm:$0xff] %v2488_v55 }
  0xde   :  { %799 = vrot.lane.b32.xlu1 %v1984_v33, %s1451_s20  ;;  %797 = vrot.lane.b32.xlu0 %v1990_v23, %s1451_s20 }
  0xdf   :  { %v2494_v10 = vpop.permute.xlu1 %707 }
  0xe0   :  { %3306 = vst [vmem:[#allocation70_spill] sm:$0xff] %v2494_v10  ;;  %v2500_v11 = vpop.permute.xlu0 %705  ;;  %v3312_v10 = vld [vmem:[#allocation32_spill] sm:$0xff] }
  0xe1   :  { %3307 = vst [vmem:[#allocation71_spill] sm:$0xff] %v2500_v11  ;;  %v3311_v11 = vld [vmem:[#allocation31_spill] sm:$0xff] }
  0xe2   :  { %803 = vrot.lane.b32.xlu1 %v2022_v27, %s1451_s20  ;;  %801 = vrot.lane.b32.xlu0 %v2028_v25, %s1451_s20 }
  0xe5   :  { %v2506_v9 = vpop.permute.xlu1 %711 }
  0xe6   :  { %807 = vrot.lane.b32.xlu1 %v2060_v50, %s1451_s20  ;;  %805 = vrot.lane.b32.xlu0 %v2066_v2, %s1451_s20  ;;  %3308 = vst [vmem:[#allocation72_spill] sm:$0xff] %v2506_v9  ;;  %v2508_v60 = vpop.permute.xlu0 %709  ;;  %v3314_v9 = vld [vmem:[#allocation33_spill] sm:$0xff] }
  0xe7   :  { %3309 = vst [vmem:[#allocation73_spill] sm:$0xff] %v2508_v60  ;;  %v3315_v60 = vld [vmem:[#allocation34_spill] sm:$0xff] }
  0xea   :  { %811 = vrot.lane.b32.xlu1 %v2098_v32, %s1451_s20  ;;  %809 = vrot.lane.b32.xlu0 %v2104_v34, %s1451_s20 }
  0xeb   :  { %v2514_v51 = vpop.permute.xlu1 %715 }
  0xec   :  { %3310 = vst [vmem:[#allocation74_spill] sm:$0xff] %v2514_v51  ;;  %v2520_v55 = vpop.permute.xlu0 %713  ;;  %v3318_v51 = vld [vmem:[#allocation35_spill] sm:$0xff] }
  0xed   :  { %3313 = vst [vmem:[#allocation75_spill] sm:$0xff] %v2520_v55  ;;  %v3321_v55 = vld [vmem:[#allocation37_spill] sm:$0xff] }
  0xee   :  { %815 = vrot.lane.b32.xlu1 %v3311_v11, %s1451_s20  ;;  %813 = vrot.lane.b32.xlu0 %v3312_v10, %s1451_s20 }
  0xf1   :  { %v2526_v62 = vpop.permute.xlu1 %719 }
  0xf2   :  { %819 = vrot.lane.b32.xlu1 %v3314_v9, %s1451_s20  ;;  %817 = vrot.lane.b32.xlu0 %v3315_v60, %s1451_s20  ;;  %3316 = vst [vmem:[#allocation76_spill] sm:$0xff] %v2526_v62  ;;  %v2528_v17 = vpop.permute.xlu0 %717  ;;  %v3324_v62 = vld [vmem:[#allocation41_spill] sm:$0xff] }
  0xf3   :  { %3317 = vst [vmem:[#allocation77_spill] sm:$0xff] %v2528_v17  ;;  %v3325_v17 = vld [vmem:[#allocation42_spill] sm:$0xff] }
  0xf6   :  { %823 = vrot.lane.b32.xlu1 %v3318_v51, %s1451_s20  ;;  %821 = vrot.lane.b32.xlu0 %v3319_v39, %s1451_s20 }
  0xf7   :  { %v2534_v56 = vpop.permute.xlu1 %723 }
  0xf8   :  { %3320 = vst [vmem:[#allocation78_spill] sm:$0xff] %v2534_v56  ;;  %v2540_v28 = vpop.permute.xlu0 %721  ;;  %v3328_v56 = vld [vmem:[#allocation45_spill] sm:$0xff] }
  0xf9   :  { %3323 = vst [vmem:[#allocation79_spill] sm:$0xff] %v2540_v28 }
  0xfa   :  { %827 = vrot.lane.b32.xlu1 %v3321_v55, %s1451_s20  ;;  %825 = vrot.lane.b32.xlu0 %v3322_v49, %s1451_s20 }
  0xfd   :  { %v2546_v35 = vpop.permute.xlu1 %727 }
  0xfe   :  { %831 = vrot.lane.b32.xlu1 %v3324_v62, %s1451_s20  ;;  %829 = vrot.lane.b32.xlu0 %v3325_v17, %s1451_s20  ;;  %3326 = vst [vmem:[#allocation80_spill] sm:$0xff] %v2546_v35  ;;  %v2548_v18 = vpop.permute.xlu0 %725 }
  0xff   :  { %3327 = vst [vmem:[#allocation81_spill] sm:$0xff] %v2548_v18 }
 0x102   :  { %835 = vrot.lane.b32.xlu1 %v3328_v56, %s1451_s20  ;;  %833 = vrot.lane.b32.xlu0 %v2336_v48, %s1451_s20 }
 0x103   :  { %v2554_v21 = vpop.permute.xlu1 %731 }
 0x104   :  { %3329 = vst [vmem:[#allocation82_spill] sm:$0xff] %v2554_v21  ;;  %v2560_v28 = vpop.permute.xlu0 %729 }
 0x105   :  { %3330 = vst [vmem:[#allocation83_spill] sm:$0xff] %v2560_v28 }
 0x106   :  { %839 = vrot.lane.b32.xlu1 %v2368_v40, %s1451_s20  ;;  %837 = vrot.lane.b32.xlu0 %v2380_v30, %s1451_s20 }
 0x109   :  { %v2566_v18 = vpop.permute.xlu1 %735 }
 0x10a   :  { %843 = vrot.lane.b32.xlu1 %v2398_v29, %s1451_s20  ;;  %841 = vrot.lane.b32.xlu0 %v2400_v43, %s1451_s20  ;;  %3331 = vst [vmem:[#allocation84_spill] sm:$0xff] %v2566_v18  ;;  %v2568_v35 = vpop.permute.xlu0 %733 }
 0x10b   :  { %3332 = vst [vmem:[#allocation85_spill] sm:$0xff] %v2568_v35 }
 0x10e   :  { %943 = vrot.lane.b32.xlu1 %v1573_v8, %s1452_s21  ;;  %941 = vrot.lane.b32.xlu0 %v1558_v54, %s1452_s21 }
 0x10f   :  { %v2574_v21 = vpop.permute.xlu1 %739 }
 0x110   :  { %3333 = vst [vmem:[#allocation86_spill] sm:$0xff] %v2574_v21 }
 0x111   :  { %v2580_v28 = vpop.permute.xlu0 %737 }
 0x112   :  { %947 = vrot.lane.b32.xlu1 %v1568_v5, %s1452_s21  ;;  %945 = vrot.lane.b32.xlu0 %v1527_v36, %s1452_s21  ;;  %3334 = vst [vmem:[#allocation87_spill] sm:$0xff] %v2580_v28 }
 0x116   :  { %951 = vrot.lane.b32.xlu1 %v1604_v37, %s1452_s21  ;;  %949 = vrot.lane.b32.xlu0 %v1610_v41, %s1452_s21  ;;  %v2586_v35 = vpop.permute.xlu1 %743 }
 0x117   :  { %3335 = vst [vmem:[#allocation88_spill] sm:$0xff] %v2586_v35  ;;  %v2588_v18 = vpop.permute.xlu0 %741 }
 0x118   :  { %3336 = vst [vmem:[#allocation89_spill] sm:$0xff] %v2588_v18 }
 0x11a   :  { %955 = vrot.lane.b32.xlu1 %v1642_v0, %s1452_s21  ;;  %953 = vrot.lane.b32.xlu0 %v1648_v7, %s1452_s21 }
 0x11c   :  { %v2594_v21 = vpop.permute.xlu1 %747  ;;  %v2596_v14 = vpop.permute.xlu0 %745 }
 0x11d   :  { %3337 = vst [vmem:[#allocation90_spill] sm:$0xff] %v2594_v21  ;;  %3338 = vst [vmem:[#allocation91_spill] sm:$0xff] %v2596_v14 }
 0x11e   :  { %959 = vrot.lane.b32.xlu1 %v1680_v38, %s1452_s21  ;;  %957 = vrot.lane.b32.xlu0 %v1686_v42, %s1452_s21 }
 0x120   :  { %v2602_v28 = vpop.permute.xlu1 %751  ;;  %v2604_v35 = vpop.permute.xlu0 %749 }
 0x122   :  { %963 = vrot.lane.b32.xlu1 %v1718_v52, %s1452_s21  ;;  %961 = vrot.lane.b32.xlu0 %v1724_v12, %s1452_s21 }
 0x124   :  { %v2610_v18 = vpop.permute.xlu1 %755  ;;  %v2612_v21 = vpop.permute.xlu0 %753 }
 0x126   :  { %967 = vrot.lane.b32.xlu1 %v1756_v44, %s1452_s21  ;;  %965 = vrot.lane.b32.xlu0 %v1762_v47, %s1452_s21 }
 0x128   :  { %v2618_v14 = vpop.permute.xlu1 %759  ;;  %v2620_v3 = vpop.permute.xlu0 %757 }
 0x12a   :  { %971 = vrot.lane.b32.xlu1 %v1794_v20, %s1452_s21  ;;  %969 = vrot.lane.b32.xlu0 %v1800_v24, %s1452_s21 }
 0x12c   :  { %v2626_v13 = vpop.permute.xlu1 %763  ;;  %v2628_v22 = vpop.permute.xlu0 %761 }
 0x12e   :  { %975 = vrot.lane.b32.xlu1 %v1832_v58, %s1452_s21  ;;  %973 = vrot.lane.b32.xlu0 %v1838_v61, %s1452_s21 }
 0x130   :  { %v2634_v63 = vpop.permute.xlu1 %767  ;;  %v2636_v46 = vpop.permute.xlu0 %765 }
 0x131   :  { %3339 = vst [vmem:[#allocation92_spill] sm:$0xff] %v2634_v63  ;;  %3340 = vst [vmem:[#allocation93_spill] sm:$0xff] %v2636_v46 }
 0x132   :  { %979 = vrot.lane.b32.xlu1 %v1870_v19, %s1452_s21  ;;  %977 = vrot.lane.b32.xlu0 %v1876_v45, %s1452_s21 }
 0x134   :  { %v2642_v15 = vpop.permute.xlu1 %771  ;;  %v2644_v1 = vpop.permute.xlu0 %769 }
 0x135   :  { %3341 = vst [vmem:[#allocation94_spill] sm:$0xff] %v2642_v15  ;;  %3342 = vst [vmem:[#allocation95_spill] sm:$0xff] %v2644_v1 }
 0x136   :  { %983 = vrot.lane.b32.xlu1 %v1908_v26, %s1452_s21  ;;  %981 = vrot.lane.b32.xlu0 %v1914_v31, %s1452_s21 }
 0x138   :  { %v2650_v6 = vpop.permute.xlu1 %775  ;;  %v2652_v63 = vpop.permute.xlu0 %773 }
 0x139   :  { %3343 = vst [vmem:[#allocation96_spill] sm:$0xff] %v2650_v6  ;;  %3344 = vst [vmem:[#allocation97_spill] sm:$0xff] %v2652_v63 }
 0x13a   :  { %987 = vrot.lane.b32.xlu1 %v1946_v4, %s1452_s21  ;;  %985 = vrot.lane.b32.xlu0 %v1952_v57, %s1452_s21 }
 0x13c   :  { %v2658_v46 = vpop.permute.xlu1 %779  ;;  %v2660_v15 = vpop.permute.xlu0 %777 }
 0x13d   :  { %3345 = vst [vmem:[#allocation98_spill] sm:$0xff] %v2658_v46  ;;  %3346 = vst [vmem:[#allocation99_spill] sm:$0xff] %v2660_v15 }
 0x13e   :  { %991 = vrot.lane.b32.xlu1 %v1984_v33, %s1452_s21  ;;  %989 = vrot.lane.b32.xlu0 %v1990_v23, %s1452_s21 }
 0x140   :  { %v2666_v1 = vpop.permute.xlu1 %783  ;;  %v2668_v6 = vpop.permute.xlu0 %781 }
 0x141   :  { %3347 = vst [vmem:[#allocation100_spill] sm:$0xff] %v2666_v1  ;;  %3348 = vst [vmem:[#allocation101_spill] sm:$0xff] %v2668_v6 }
 0x142   :  { %995 = vrot.lane.b32.xlu1 %v2022_v27, %s1452_s21  ;;  %993 = vrot.lane.b32.xlu0 %v2028_v25, %s1452_s21 }
 0x144   :  { %v2674_v63 = vpop.permute.xlu1 %787  ;;  %v2676_v46 = vpop.permute.xlu0 %785 }
 0x145   :  { %3349 = vst [vmem:[#allocation102_spill] sm:$0xff] %v2674_v63  ;;  %3350 = vst [vmem:[#allocation103_spill] sm:$0xff] %v2676_v46 }
 0x146   :  { %999 = vrot.lane.b32.xlu1 %v2060_v50, %s1452_s21  ;;  %997 = vrot.lane.b32.xlu0 %v2066_v2, %s1452_s21 }
 0x148   :  { %v2682_v15 = vpop.permute.xlu1 %791  ;;  %v2684_v1 = vpop.permute.xlu0 %789 }
 0x149   :  { %3351 = vst [vmem:[#allocation104_spill] sm:$0xff] %v2682_v15  ;;  %3352 = vst [vmem:[#allocation105_spill] sm:$0xff] %v2684_v1 }
 0x14a   :  { %1003 = vrot.lane.b32.xlu1 %v2098_v32, %s1452_s21  ;;  %1001 = vrot.lane.b32.xlu0 %v2104_v34, %s1452_s21 }
 0x14c   :  { %v2690_v6 = vpop.permute.xlu1 %795  ;;  %v2692_v63 = vpop.permute.xlu0 %793 }
 0x14d   :  { %3353 = vst [vmem:[#allocation106_spill] sm:$0xff] %v2690_v6  ;;  %3354 = vst [vmem:[#allocation107_spill] sm:$0xff] %v2692_v63 }
 0x14e   :  { %1007 = vrot.lane.b32.xlu1 %v3311_v11, %s1452_s21  ;;  %1005 = vrot.lane.b32.xlu0 %v3312_v10, %s1452_s21 }
 0x150   :  { %v2698_v46 = vpop.permute.xlu1 %799  ;;  %v2700_v15 = vpop.permute.xlu0 %797 }
 0x151   :  { %3355 = vst [vmem:[#allocation108_spill] sm:$0xff] %v2698_v46  ;;  %3356 = vst [vmem:[#allocation109_spill] sm:$0xff] %v2700_v15 }
 0x152   :  { %1011 = vrot.lane.b32.xlu1 %v3314_v9, %s1452_s21  ;;  %1009 = vrot.lane.b32.xlu0 %v3315_v60, %s1452_s21 }
 0x154   :  { %v2706_v1 = vpop.permute.xlu1 %803  ;;  %v2708_v6 = vpop.permute.xlu0 %801 }
 0x155   :  { %3357 = vst [vmem:[#allocation110_spill] sm:$0xff] %v2706_v1  ;;  %3358 = vst [vmem:[#allocation111_spill] sm:$0xff] %v2708_v6 }
 0x156   :  { %1015 = vrot.lane.b32.xlu1 %v3318_v51, %s1452_s21  ;;  %1013 = vrot.lane.b32.xlu0 %v3319_v39, %s1452_s21 }
 0x158   :  { %v2714_v63 = vpop.permute.xlu1 %807  ;;  %v2716_v46 = vpop.permute.xlu0 %805 }
 0x159   :  { %3359 = vst [vmem:[#allocation112_spill] sm:$0xff] %v2714_v63  ;;  %3360 = vst [vmem:[#allocation113_spill] sm:$0xff] %v2716_v46 }
 0x15a   :  { %1019 = vrot.lane.b32.xlu1 %v3321_v55, %s1452_s21  ;;  %1017 = vrot.lane.b32.xlu0 %v3322_v49, %s1452_s21 }
 0x15c   :  { %v2722_v15 = vpop.permute.xlu1 %811  ;;  %v2724_v1 = vpop.permute.xlu0 %809 }
 0x15d   :  { %3361 = vst [vmem:[#allocation114_spill] sm:$0xff] %v2722_v15  ;;  %3362 = vst [vmem:[#allocation115_spill] sm:$0xff] %v2724_v1 }
 0x15e   :  { %1023 = vrot.lane.b32.xlu1 %v3324_v62, %s1452_s21  ;;  %1021 = vrot.lane.b32.xlu0 %v3325_v17, %s1452_s21 }
 0x160   :  { %v2730_v6 = vpop.permute.xlu1 %815  ;;  %v2732_v63 = vpop.permute.xlu0 %813 }
 0x161   :  { %3363 = vst [vmem:[#allocation116_spill] sm:$0xff] %v2730_v6  ;;  %3364 = vst [vmem:[#allocation117_spill] sm:$0xff] %v2732_v63 }
 0x162   :  { %1027 = vrot.lane.b32.xlu1 %v3328_v56, %s1452_s21  ;;  %1025 = vrot.lane.b32.xlu0 %v2336_v48, %s1452_s21 }
 0x164   :  { %v2738_v46 = vpop.permute.xlu1 %819  ;;  %v2740_v15 = vpop.permute.xlu0 %817 }
 0x165   :  { %3365 = vst [vmem:[#allocation118_spill] sm:$0xff] %v2738_v46  ;;  %3366 = vst [vmem:[#allocation119_spill] sm:$0xff] %v2740_v15 }
 0x166   :  { %1031 = vrot.lane.b32.xlu1 %v2368_v40, %s1452_s21  ;;  %1029 = vrot.lane.b32.xlu0 %v2380_v30, %s1452_s21 }
 0x168   :  { %v2746_v1 = vpop.permute.xlu1 %823  ;;  %v2748_v6 = vpop.permute.xlu0 %821 }
 0x169   :  { %3367 = vst [vmem:[#allocation120_spill] sm:$0xff] %v2746_v1  ;;  %3368 = vst [vmem:[#allocation121_spill] sm:$0xff] %v2748_v6 }
 0x16a   :  { %1035 = vrot.lane.b32.xlu1 %v2398_v29, %s1452_s21  ;;  %1033 = vrot.lane.b32.xlu0 %v2400_v43, %s1452_s21 }
 0x16c   :  { %v2754_v63 = vpop.permute.xlu1 %827  ;;  %v2756_v46 = vpop.permute.xlu0 %825 }
 0x16d   :  { %3369 = vst [vmem:[#allocation122_spill] sm:$0xff] %v2754_v63  ;;  %3370 = vst [vmem:[#allocation123_spill] sm:$0xff] %v2756_v46 }
 0x16e   :  { %1039 = vrot.lane.b32.xlu1 %v1573_v8, %s1453_s22  ;;  %1037 = vrot.lane.b32.xlu0 %v1558_v54, %s1453_s22 }
 0x170   :  { %v2762_v1 = vpop.permute.xlu1 %831  ;;  %v2764_v6 = vpop.permute.xlu0 %829 }
 0x171   :  { %3371 = vst [vmem:[#allocation124_spill] sm:$0xff] %v2762_v1  ;;  %3372 = vst [vmem:[#allocation125_spill] sm:$0xff] %v2764_v6 }
 0x172   :  { %1043 = vrot.lane.b32.xlu1 %v1568_v5, %s1453_s22  ;;  %1041 = vrot.lane.b32.xlu0 %v1527_v36, %s1453_s22 }
 0x174   :  { %v2770_v63 = vpop.permute.xlu1 %835  ;;  %v2772_v46 = vpop.permute.xlu0 %833 }
 0x175   :  { %3373 = vst [vmem:[#allocation126_spill] sm:$0xff] %v2770_v63  ;;  %3374 = vst [vmem:[#allocation127_spill] sm:$0xff] %v2772_v46 }
 0x176   :  { %1047 = vrot.lane.b32.xlu1 %v1604_v37, %s1453_s22  ;;  %1045 = vrot.lane.b32.xlu0 %v1610_v41, %s1453_s22 }
 0x178   :  { %v2778_v15 = vpop.permute.xlu1 %839  ;;  %v2780_v1 = vpop.permute.xlu0 %837 }
 0x179   :  { %3375 = vst [vmem:[#allocation128_spill] sm:$0xff] %v2778_v15  ;;  %3376 = vst [vmem:[#allocation129_spill] sm:$0xff] %v2780_v1 }
 0x17a   :  { %1051 = vrot.lane.b32.xlu1 %v1642_v0, %s1453_s22  ;;  %1049 = vrot.lane.b32.xlu0 %v1648_v7, %s1453_s22 }
 0x17c   :  { %v2786_v6 = vpop.permute.xlu1 %843  ;;  %v2788_v63 = vpop.permute.xlu0 %841 }
 0x17d   :  { %3377 = vst [vmem:[#allocation130_spill] sm:$0xff] %v2786_v6  ;;  %3378 = vst [vmem:[#allocation131_spill] sm:$0xff] %v2788_v63 }
 0x17e   :  { %1055 = vrot.lane.b32.xlu1 %v1680_v38, %s1453_s22  ;;  %1053 = vrot.lane.b32.xlu0 %v1686_v42, %s1453_s22 }
 0x180   :  { %v2794_v46 = vpop.permute.xlu1 %943  ;;  %v2796_v15 = vpop.permute.xlu0 %941 }
 0x182   :  { %1059 = vrot.lane.b32.xlu1 %v1718_v52, %s1453_s22  ;;  %1057 = vrot.lane.b32.xlu0 %v1724_v12, %s1453_s22 }
 0x184   :  { %v2802_v1 = vpop.permute.xlu1 %947  ;;  %v2804_v6 = vpop.permute.xlu0 %945 }
 0x186   :  { %1063 = vrot.lane.b32.xlu1 %v1756_v44, %s1453_s22  ;;  %1061 = vrot.lane.b32.xlu0 %v1762_v47, %s1453_s22 }
 0x188   :  { %v2810_v63 = vpop.permute.xlu1 %951  ;;  %v2812_v42 = vpop.permute.xlu0 %949 }
 0x18a   :  { %1067 = vrot.lane.b32.xlu1 %v1794_v20, %s1453_s22  ;;  %1065 = vrot.lane.b32.xlu0 %v1800_v24, %s1453_s22 }
 0x18c   :  { %v2818_v12 = vpop.permute.xlu1 %955  ;;  %v2820_v52 = vpop.permute.xlu0 %953 }
 0x18e   :  { %1071 = vrot.lane.b32.xlu1 %v1832_v58, %s1453_s22  ;;  %1069 = vrot.lane.b32.xlu0 %v1838_v61, %s1453_s22 }
 0x190   :  { %v2826_v47 = vpop.permute.xlu1 %959  ;;  %v2828_v44 = vpop.permute.xlu0 %957 }
 0x192   :  { %1075 = vrot.lane.b32.xlu1 %v1870_v19, %s1453_s22  ;;  %1073 = vrot.lane.b32.xlu0 %v1876_v45, %s1453_s22 }
 0x194   :  { %v2834_v24 = vpop.permute.xlu1 %963  ;;  %v2836_v20 = vpop.permute.xlu0 %961 }
 0x196   :  { %1079 = vrot.lane.b32.xlu1 %v1908_v26, %s1453_s22  ;;  %1077 = vrot.lane.b32.xlu0 %v1914_v31, %s1453_s22 }
 0x198   :  { %v2842_v61 = vpop.permute.xlu1 %967  ;;  %v2844_v58 = vpop.permute.xlu0 %965 }
 0x19a   :  { %1083 = vrot.lane.b32.xlu1 %v1946_v4, %s1453_s22  ;;  %1081 = vrot.lane.b32.xlu0 %v1952_v57, %s1453_s22 }
 0x19c   :  { %v2850_v45 = vpop.permute.xlu1 %971  ;;  %v2852_v19 = vpop.permute.xlu0 %969 }
 0x19e   :  { %1087 = vrot.lane.b32.xlu1 %v1984_v33, %s1453_s22  ;;  %1085 = vrot.lane.b32.xlu0 %v1990_v23, %s1453_s22 }
 0x1a0   :  { %v2858_v31 = vpop.permute.xlu1 %975  ;;  %v2860_v26 = vpop.permute.xlu0 %973 }
 0x1a2   :  { %1091 = vrot.lane.b32.xlu1 %v2022_v27, %s1453_s22  ;;  %1089 = vrot.lane.b32.xlu0 %v2028_v25, %s1453_s22 }
 0x1a4   :  { %v2866_v57 = vpop.permute.xlu1 %979  ;;  %v2868_v4 = vpop.permute.xlu0 %977 }
 0x1a6   :  { %1095 = vrot.lane.b32.xlu1 %v2060_v50, %s1453_s22  ;;  %1093 = vrot.lane.b32.xlu0 %v2066_v2, %s1453_s22 }
 0x1a8   :  { %v2874_v23 = vpop.permute.xlu1 %983  ;;  %v2876_v33 = vpop.permute.xlu0 %981 }
 0x1aa   :  { %1099 = vrot.lane.b32.xlu1 %v2098_v32, %s1453_s22  ;;  %1097 = vrot.lane.b32.xlu0 %v2104_v34, %s1453_s22 }
 0x1ac   :  { %v2882_v25 = vpop.permute.xlu1 %987  ;;  %v2884_v27 = vpop.permute.xlu0 %985 }
 0x1ae   :  { %1103 = vrot.lane.b32.xlu1 %v3311_v11, %s1453_s22  ;;  %1101 = vrot.lane.b32.xlu0 %v3312_v10, %s1453_s22 }
 0x1b0   :  { %v2890_v2 = vpop.permute.xlu1 %991  ;;  %v2892_v50 = vpop.permute.xlu0 %989 }
 0x1b2   :  { %1107 = vrot.lane.b32.xlu1 %v3314_v9, %s1453_s22  ;;  %1105 = vrot.lane.b32.xlu0 %v3315_v60, %s1453_s22 }
 0x1b4   :  { %v2898_v34 = vpop.permute.xlu1 %995  ;;  %v2900_v32 = vpop.permute.xlu0 %993 }
 0x1b6   :  { %1111 = vrot.lane.b32.xlu1 %v3318_v51, %s1453_s22  ;;  %1109 = vrot.lane.b32.xlu0 %v3319_v39, %s1453_s22 }
 0x1b8   :  { %v2906_v10 = vpop.permute.xlu1 %999  ;;  %v2908_v11 = vpop.permute.xlu0 %997 }
 0x1ba   :  { %1115 = vrot.lane.b32.xlu1 %v3321_v55, %s1453_s22  ;;  %1113 = vrot.lane.b32.xlu0 %v3322_v49, %s1453_s22 }
 0x1bc   :  { %v2914_v60 = vpop.permute.xlu1 %1003  ;;  %v2916_v9 = vpop.permute.xlu0 %1001 }
 0x1bd   :  { %3379 = vst [vmem:[#allocation132_spill] sm:$0xff] %v2914_v60  ;;  %3380 = vst [vmem:[#allocation133_spill] sm:$0xff] %v2916_v9 }
 0x1be   :  { %1119 = vrot.lane.b32.xlu1 %v3324_v62, %s1453_s22  ;;  %1117 = vrot.lane.b32.xlu0 %v3325_v17, %s1453_s22 }
 0x1c0   :  { %v2922_v39 = vpop.permute.xlu1 %1007  ;;  %v2924_v51 = vpop.permute.xlu0 %1005 }
 0x1c1   :  { %3381 = vst [vmem:[#allocation134_spill] sm:$0xff] %v2922_v39  ;;  %3382 = vst [vmem:[#allocation135_spill] sm:$0xff] %v2924_v51 }
 0x1c2   :  { %1123 = vrot.lane.b32.xlu1 %v3328_v56, %s1453_s22  ;;  %1121 = vrot.lane.b32.xlu0 %v2336_v48, %s1453_s22 }
 0x1c4   :  { %v2930_v49 = vpop.permute.xlu1 %1011  ;;  %v2932_v55 = vpop.permute.xlu0 %1009 }
 0x1c5   :  { %3383 = vst [vmem:[#allocation136_spill] sm:$0xff] %v2930_v49  ;;  %3384 = vst [vmem:[#allocation137_spill] sm:$0xff] %v2932_v55 }
 0x1c6   :  { %1127 = vrot.lane.b32.xlu1 %v2368_v40, %s1453_s22  ;;  %1125 = vrot.lane.b32.xlu0 %v2380_v30, %s1453_s22 }
 0x1c8   :  { %v2938_v17 = vpop.permute.xlu1 %1015  ;;  %v2940_v62 = vpop.permute.xlu0 %1013 }
 0x1c9   :  { %3385 = vst [vmem:[#allocation138_spill] sm:$0xff] %v2938_v17  ;;  %3386 = vst [vmem:[#allocation139_spill] sm:$0xff] %v2940_v62 }
 0x1ca   :  { %1131 = vrot.lane.b32.xlu1 %v2398_v29, %s1453_s22  ;;  %1129 = vrot.lane.b32.xlu0 %v2400_v43, %s1453_s22  ;;  %v3397_v43 = vld [vmem:[#allocation44_spill] sm:$0xff] }
 0x1cc   :  { %v2946_v48 = vpop.permute.xlu1 %1019  ;;  %v2948_v56 = vpop.permute.xlu0 %1017 }
 0x1cd   :  { %3387 = vst [vmem:[#allocation140_spill] sm:$0xff] %v2946_v48  ;;  %3388 = vst [vmem:[#allocation141_spill] sm:$0xff] %v2948_v56  ;;  %v846_v48 = vmin.f32 %v3397_v43, %v2602_v28  ;;  %v3398_v56 = vld [vmem:[#allocation40_spill] sm:$0xff] }
 0x1d0   :  { %v2950_v55 = vpop.permute.xlu1 %1023  ;;  %v2952_v40 = vpop.permute.xlu0 %1021 }
 0x1d1   :  { %3389 = vst [vmem:[#allocation142_spill] sm:$0xff] %v2950_v55  ;;  %3390 = vst [vmem:[#allocation143_spill] sm:$0xff] %v2952_v40  ;;  %v845_v55 = vmin.f32 %v3398_v56, %v2604_v35  ;;  %v3399_v40 = vld [vmem:[#allocation43_spill] sm:$0xff] }
 0x1d2   :  { %v848_v39 = vmin.f32 %v3399_v40, %v2610_v18  ;;  %v850_v40 = vmin.f32 %v2352_v53, %v2618_v14 }
 0x1d4   :  { %v2954_v49 = vpop.permute.xlu1 %1027  ;;  %v2956_v30 = vpop.permute.xlu0 %1025  ;;  %v896_v35 = vmin.f32 %v1568_v5, %v848_v39 }
 0x1d5   :  { %3391 = vst [vmem:[#allocation144_spill] sm:$0xff] %v2954_v49  ;;  %3392 = vst [vmem:[#allocation145_spill] sm:$0xff] %v2956_v30  ;;  %v3400_v49 = vld [vmem:[#allocation39_spill] sm:$0xff] }
 0x1d6   :  { %v847_v30 = vmin.f32 %v3400_v49, %v2612_v21  ;;  %v849_v21 = vmin.f32 %v2358_v16, %v2620_v3  ;;  %v1352_v49 = vld [vmem:[#allocation2] sm:$0xff]  ;;  %v852_v16 = vmin.f32 %v2392_v59, %v2626_v13  ;;  %v3401_v3 = vld [vmem:[#allocation49_spill] sm:$0xff] }
 0x1d7   :  { %v851_v14 = vmin.f32 %v3401_v3, %v2628_v22  ;;  %v3402_v13 = vld [vmem:[#allocation92_spill] sm:$0xff] }
 0x1d8   :  { %v2958_v17 = vpop.permute.xlu1 %1031  ;;  %v2960_v62 = vpop.permute.xlu0 %1029  ;;  %v895_v56 = vmin.f32 %v1527_v36, %v847_v30  ;;  %v898_v30 = vmin.f32 %v1604_v37, %v850_v40  ;;  %v897_v53 = vmin.f32 %v1610_v41, %v849_v21  ;;  %v3403_v22 = vld [vmem:[#allocation52_spill] sm:$0xff] }
 0x1d9   :  { %3393 = vst [vmem:[#allocation146_spill] sm:$0xff] %v2958_v17  ;;  %3394 = vst [vmem:[#allocation147_spill] sm:$0xff] %v2960_v62  ;;  %v894_v62 = vmin.f32 %v1573_v8, %v846_v48  ;;  %v1351_v48 = vld [vmem:[#allocation2 + $0x8] sm:$0xff]  ;;  %v899_v59 = vmin.f32 %v1648_v7, %v851_v14 }
 0x1dc   :  { %v2962_v29 = vpop.permute.xlu1 %1035  ;;  %v2964_v51 = vpop.permute.xlu0 %1033 }
 0x1dd   :  { %3395 = vst [vmem:[#allocation148_spill] sm:$0xff] %v2962_v29  ;;  %3396 = vst [vmem:[#allocation149_spill] sm:$0xff] %v2964_v51  ;;  %v893_v29 = vmin.f32 %v1558_v54, %v845_v55  ;;  %v1354_v55 = vld [vmem:[#allocation2 + $0x10] sm:$0xff] }
 0x1e0   :  { %v1040_v9 = vpop.permute.xlu1 %1039  ;;  %v1038_v17 = vpop.permute.xlu0 %1037 }
 0x1e1   :  { %v1134_v51 = vmin.f32 %v2794_v46, %v1040_v9  ;;  %v1133_v60 = vmin.f32 %v2796_v15, %v1038_v17 }
 0x1e3   :  { %v1182_v43 = vmin.f32 %v894_v62, %v1134_v51  ;;  %v1181_v28 = vmin.f32 %v893_v29, %v1133_v60  ;;  %v1353_v62 = vld [vmem:[#allocation2 + $0x18] sm:$0xff]  ;;  %v900_v51 = vmin.f32 %v1642_v0, %v852_v16 }
 0x1e4   :  { %v1044_v18 = vpop.permute.xlu1 %1043  ;;  %v1042_v8 = vpop.permute.xlu0 %1041 }
 0x1e5   :  { %v1230_v54 = vsub.f32 %v1351_v48, %v1182_v43  ;;  %v1229_v46 = vsub.f32 %v1352_v49, %v1181_v28  ;;  %v1136_v15 = vmin.f32 %v2802_v1, %v1044_v18  ;;  %v1135_v29 = vmin.f32 %v2804_v6, %v1042_v8  ;;  %v3404_v28 = vld [vmem:[#allocation93_spill] sm:$0xff]  ;;  %v1356_v8 = vld [vmem:[#allocation2 + $0x20] sm:$0xff] }
 0x1e6   :  { %v854_v43 = vmin.f32 %v3403_v22, %v3402_v13  ;;  %v1355_v18 = vld [vmem:[#allocation2 + $0x28] sm:$0xff] }
 0x1e7   :  { %1278 = vst [vmem:[#allocation5 + $0x8] sm:$0xff] %v1230_v54  ;;  %1277 = vst [vmem:[#allocation5] sm:$0xff] %v1229_v46  ;;  %v1184_v5 = vmin.f32 %v896_v35, %v1136_v15  ;;  %v1183_v36 = vmin.f32 %v895_v56, %v1135_v29  ;;  %v3405_v35 = vld [vmem:[#allocation53_spill] sm:$0xff]  ;;  %v3406_v46 = vld [vmem:[#allocation8_spill] sm:$0xff] }
 0x1e8   :  { %v1048_v39 = vpop.permute.xlu1 %1047  ;;  %v1046_v17 = vpop.permute.xlu0 %1045  ;;  %v853_v56 = vmin.f32 %v3405_v35, %v3404_v28  ;;  %v902_v49 = vmin.f32 %v1680_v38, %v854_v43  ;;  %v3407_v29 = vld [vmem:[#allocation94_spill] sm:$0xff]  ;;  %v3415_v13 = vld [vmem:[#allocation97_spill] sm:$0xff] }
 0x1e9   :  { %v1232_v1 = vsub.f32 %v1353_v62, %v1184_v5  ;;  %v1231_v6 = vsub.f32 %v1354_v55, %v1183_v36  ;;  %v1138_v9 = vmin.f32 %v2810_v63, %v1048_v39  ;;  %v1137_v60 = vmin.f32 %v2812_v42, %v1046_v17  ;;  %v3408_v5 = vld [vmem:[#allocation54_spill] sm:$0xff]  ;;  %v1357_v39 = vld [vmem:[#allocation2 + $0x38] sm:$0xff]  ;;  %v3416_v22 = vld [vmem:[#allocation57_spill] sm:$0xff] }
 0x1ea   :  { %v901_v15 = vmin.f32 %v3406_v46, %v853_v56  ;;  %v856_v36 = vmin.f32 %v3408_v5, %v3407_v29  ;;  %v1358_v17 = vld [vmem:[#allocation2 + $0x30] sm:$0xff]  ;;  %v857_v43 = vmin.f32 %v3416_v22, %v3415_v13  ;;  %v1359_v56 = vld [vmem:[#allocation2 + $0x48] sm:$0xff]  ;;  %v3422_v29 = vld [vmem:[#allocation59_spill] sm:$0xff] }
 0x1eb   :  { %1280 = vst [vmem:[#allocation5 + $0x18] sm:$0xff] %v1232_v1  ;;  %1279 = vst [vmem:[#allocation5 + $0x10] sm:$0xff] %v1231_v6  ;;  %v1186_v37 = vmin.f32 %v898_v30, %v1138_v9  ;;  %v1185_v41 = vmin.f32 %v897_v53, %v1137_v60  ;;  %v3409_v30 = vld [vmem:[#allocation95_spill] sm:$0xff]  ;;  %v3411_v6 = vld [vmem:[#allocation9_spill] sm:$0xff] }
 0x1ec   :  { %v1052_v40 = vpop.permute.xlu1 %1051  ;;  %v1050_v21 = vpop.permute.xlu0 %1049  ;;  %v3410_v53 = vld [vmem:[#allocation55_spill] sm:$0xff]  ;;  %v904_v9 = vmin.f32 %v3411_v6, %v856_v36  ;;  %v3412_v60 = vld [vmem:[#allocation10_spill] sm:$0xff]  ;;  %v1364_v13 = vld [vmem:[#allocation2 + $0x60] sm:$0xff] }
 0x1ed   :  { %v1234_v63 = vsub.f32 %v1355_v18, %v1186_v37  ;;  %v1233_v42 = vsub.f32 %v1356_v8, %v1185_v41  ;;  %v1140_v48 = vmin.f32 %v2818_v12, %v1052_v40  ;;  %v1139_v54 = vmin.f32 %v2820_v52, %v1050_v21  ;;  %v3413_v41 = vld [vmem:[#allocation96_spill] sm:$0xff] }
 0x1ee   :  { %v855_v16 = vmin.f32 %v3410_v53, %v3409_v30  ;;  %v1360_v40 = vld [vmem:[#allocation2 + $0x40] sm:$0xff]  ;;  %v1361_v53 = vld [vmem:[#allocation2 + $0x58] sm:$0xff] }
 0x1ef   :  { %1282 = vst [vmem:[#allocation5 + $0x28] sm:$0xff] %v1234_v63  ;;  %1281 = vst [vmem:[#allocation5 + $0x20] sm:$0xff] %v1233_v42  ;;  %v1188_v0 = vmin.f32 %v900_v51, %v1140_v48  ;;  %v1187_v7 = vmin.f32 %v899_v59, %v1139_v54  ;;  %v3414_v51 = vld [vmem:[#allocation56_spill] sm:$0xff]  ;;  %v3417_v42 = vld [vmem:[#allocation11_spill] sm:$0xff] }
 0x1f0   :  { %v1056_v3 = vpop.permute.xlu1 %1055  ;;  %v1054_v14 = vpop.permute.xlu0 %1053  ;;  %v903_v37 = vmin.f32 %v3412_v60, %v855_v16  ;;  %v858_v59 = vmin.f32 %v3414_v51, %v3413_v41  ;;  %v3418_v54 = vld [vmem:[#allocation12_spill] sm:$0xff]  ;;  %v1362_v16 = vld [vmem:[#allocation2 + $0x50] sm:$0xff]  ;;  %v3428_v60 = vld [vmem:[#allocation61_spill] sm:$0xff] }
 0x1f1   :  { %v1236_v12 = vsub.f32 %v1357_v39, %v1188_v0  ;;  %v1235_v52 = vsub.f32 %v1358_v17, %v1187_v7  ;;  %v1142_v62 = vmin.f32 %v2826_v47, %v1056_v3  ;;  %v1141_v1 = vmin.f32 %v2828_v44, %v1054_v14  ;;  %v3419_v7 = vld [vmem:[#allocation98_spill] sm:$0xff]  ;;  %v3423_v17 = vld [vmem:[#allocation13_spill] sm:$0xff] }
 0x1f2   :  { %v906_v48 = vmin.f32 %v3417_v42, %v858_v59  ;;  %v905_v0 = vmin.f32 %v3418_v54, %v857_v43  ;;  %v1363_v59 = vld [vmem:[#allocation2 + $0x68] sm:$0xff]  ;;  %v3434_v42 = vld [vmem:[#allocation63_spill] sm:$0xff] }
 0x1f3   :  { %1284 = vst [vmem:[#allocation5 + $0x38] sm:$0xff] %v1236_v12  ;;  %1283 = vst [vmem:[#allocation5 + $0x30] sm:$0xff] %v1235_v52  ;;  %v1190_v38 = vmin.f32 %v902_v49, %v1142_v62  ;;  %v1189_v55 = vmin.f32 %v901_v15, %v1141_v1  ;;  %v3420_v49 = vld [vmem:[#allocation58_spill] sm:$0xff]  ;;  %v3421_v15 = vld [vmem:[#allocation99_spill] sm:$0xff] }
 0x1f4   :  { %v1060_v28 = vpop.permute.xlu1 %1059  ;;  %v1058_v35 = vpop.permute.xlu0 %1057  ;;  %v860_v46 = vmin.f32 %v3420_v49, %v3419_v7  ;;  %v859_v5 = vmin.f32 %v3422_v29, %v3421_v15  ;;  %v3424_v62 = vld [vmem:[#allocation14_spill] sm:$0xff]  ;;  %v1365_v7 = vld [vmem:[#allocation2 + $0x78] sm:$0xff] }
 0x1f5   :  { %v1238_v47 = vsub.f32 %v1359_v56, %v1190_v38  ;;  %v1237_v44 = vsub.f32 %v1360_v40, %v1189_v55  ;;  %v1144_v21 = vmin.f32 %v2834_v24, %v1060_v28  ;;  %v1143_v18 = vmin.f32 %v2836_v20, %v1058_v35  ;;  %v3425_v38 = vld [vmem:[#allocation100_spill] sm:$0xff]  ;;  %v3429_v56 = vld [vmem:[#allocation15_spill] sm:$0xff]  ;;  %v1366_v49 = vld [vmem:[#allocation2 + $0x70] sm:$0xff] }
 0x1f6   :  { %v908_v52 = vmin.f32 %v3423_v17, %v860_v46  ;;  %v907_v1 = vmin.f32 %v3424_v62, %v859_v5  ;;  %v3426_v55 = vld [vmem:[#allocation60_spill] sm:$0xff]  ;;  %v1367_v62 = vld [vmem:[#allocation2 + $0x88] sm:$0xff] }
 0x1f7   :  { %1286 = vst [vmem:[#allocation5 + $0x48] sm:$0xff] %v1238_v47  ;;  %1285 = vst [vmem:[#allocation5 + $0x40] sm:$0xff] %v1237_v44  ;;  %v1192_v63 = vmin.f32 %v904_v9, %v1144_v21  ;;  %v1191_v8 = vmin.f32 %v903_v37, %v1143_v18  ;;  %v862_v6 = vmin.f32 %v3426_v55, %v3425_v38  ;;  %v3427_v9 = vld [vmem:[#allocation101_spill] sm:$0xff]  ;;  %v3430_v40 = vld [vmem:[#allocation16_spill] sm:$0xff] }
 0x1f8   :  { %v1064_v36 = vpop.permute.xlu1 %1063  ;;  %v1062_v30 = vpop.permute.xlu0 %1061  ;;  %v861_v37 = vmin.f32 %v3428_v60, %v3427_v9  ;;  %v3431_v21 = vld [vmem:[#allocation102_spill] sm:$0xff]  ;;  %v3441_v60 = vld [vmem:[#allocation19_spill] sm:$0xff] }
 0x1f9   :  { %v1240_v24 = vsub.f32 %v1361_v53, %v1192_v63  ;;  %v1239_v20 = vsub.f32 %v1362_v16, %v1191_v8  ;;  %v1146_v3 = vmin.f32 %v2842_v61, %v1064_v36  ;;  %v1145_v14 = vmin.f32 %v2844_v58, %v1062_v30  ;;  %v3432_v18 = vld [vmem:[#allocation62_spill] sm:$0xff]  ;;  %v3433_v8 = vld [vmem:[#allocation103_spill] sm:$0xff]  ;;  %v3435_v36 = vld [vmem:[#allocation17_spill] sm:$0xff] }
 0x1fa   :  { %v910_v47 = vmin.f32 %v3429_v56, %v862_v6  ;;  %v909_v44 = vmin.f32 %v3430_v40, %v861_v37  ;;  %v864_v63 = vmin.f32 %v3432_v18, %v3431_v21  ;;  %v3436_v53 = vld [vmem:[#allocation18_spill] sm:$0xff]  ;;  %v3437_v16 = vld [vmem:[#allocation104_spill] sm:$0xff]  ;;  %v1369_v56 = vld [vmem:[#allocation2 + $0x98] sm:$0xff] }
 0x1fb   :  { %1288 = vst [vmem:[#allocation5 + $0x58] sm:$0xff] %v1240_v24  ;;  %1287 = vst [vmem:[#allocation5 + $0x50] sm:$0xff] %v1239_v20  ;;  %v1194_v39 = vmin.f32 %v906_v48, %v1146_v3  ;;  %v1193_v12 = vmin.f32 %v905_v0, %v1145_v14  ;;  %v863_v48 = vmin.f32 %v3434_v42, %v3433_v8  ;;  %v3438_v20 = vld [vmem:[#allocation64_spill] sm:$0xff]  ;;  %v3439_v14 = vld [vmem:[#allocation105_spill] sm:$0xff] }
 0x1fc   :  { %v1068_v41 = vpop.permute.xlu1 %1067  ;;  %v1066_v51 = vpop.permute.xlu0 %1065  ;;  %v912_v30 = vmin.f32 %v3435_v36, %v864_v63  ;;  %v866_v3 = vmin.f32 %v3438_v20, %v3437_v16  ;;  %v3447_v63 = vld [vmem:[#allocation21_spill] sm:$0xff]  ;;  %v3448_v42 = vld [vmem:[#allocation22_spill] sm:$0xff]  ;;  %v3453_v16 = vld [vmem:[#allocation23_spill] sm:$0xff] }
 0x1fd   :  { %v1242_v61 = vsub.f32 %v1363_v59, %v1194_v39  ;;  %v1241_v58 = vsub.f32 %v1364_v13, %v1193_v12  ;;  %v1148_v22 = vmin.f32 %v2850_v45, %v1068_v41  ;;  %v1147_v43 = vmin.f32 %v2852_v19, %v1066_v51  ;;  %v3440_v39 = vld [vmem:[#allocation65_spill] sm:$0xff]  ;;  %v3442_v41 = vld [vmem:[#allocation20_spill] sm:$0xff]  ;;  %v3443_v59 = vld [vmem:[#allocation106_spill] sm:$0xff] }
 0x1fe   :  { %v911_v24 = vmin.f32 %v3436_v53, %v863_v48  ;;  %v865_v12 = vmin.f32 %v3440_v39, %v3439_v14  ;;  %v914_v37 = vmin.f32 %v3441_v60, %v866_v3  ;;  %v3454_v3 = vld [vmem:[#allocation24_spill] sm:$0xff]  ;;  %v3455_v39 = vld [vmem:[#allocation110_spill] sm:$0xff] }
 0x1ff   :  { %1290 = vst [vmem:[#allocation5 + $0x68] sm:$0xff] %v1242_v61  ;;  %1289 = vst [vmem:[#allocation5 + $0x60] sm:$0xff] %v1241_v58  ;;  %v1196_v28 = vmin.f32 %v908_v52, %v1148_v22  ;;  %v1195_v35 = vmin.f32 %v907_v1, %v1147_v43  ;;  %v1368_v1 = vld [vmem:[#allocation2 + $0x80] sm:$0xff]  ;;  %v3444_v61 = vld [vmem:[#allocation66_spill] sm:$0xff] }
 0x200   :  { %v1072_v54 = vpop.permute.xlu1 %1071  ;;  %v1070_v0 = vpop.permute.xlu0 %1069  ;;  %v913_v51 = vmin.f32 %v3442_v41, %v865_v12  ;;  %v868_v13 = vmin.f32 %v3444_v61, %v3443_v59  ;;  %v3445_v58 = vld [vmem:[#allocation107_spill] sm:$0xff]  ;;  %v3456_v12 = vld [vmem:[#allocation70_spill] sm:$0xff]  ;;  %v3459_v41 = vld [vmem:[#allocation25_spill] sm:$0xff] }
 0x201   :  { %v1244_v45 = vsub.f32 %v1365_v7, %v1196_v28  ;;  %v1243_v19 = vsub.f32 %v1366_v49, %v1195_v35  ;;  %v1150_v46 = vmin.f32 %v2858_v31, %v1072_v54  ;;  %v1149_v15 = vmin.f32 %v2860_v26, %v1070_v0  ;;  %v3446_v22 = vld [vmem:[#allocation67_spill] sm:$0xff]  ;;  %v3449_v54 = vld [vmem:[#allocation108_spill] sm:$0xff]  ;;  %v3452_v49 = vld [vmem:[#allocation69_spill] sm:$0xff] }
 0x202   :  { %v867_v43 = vmin.f32 %v3446_v22, %v3445_v58  ;;  %v916_v8 = vmin.f32 %v3447_v63, %v868_v13  ;;  %v3450_v0 = vld [vmem:[#allocation68_spill] sm:$0xff]  ;;  %v3460_v59 = vld [vmem:[#allocation26_spill] sm:$0xff]  ;;  %v3465_v63 = vld [vmem:[#allocation27_spill] sm:$0xff] }
 0x203   :  { %1292 = vst [vmem:[#allocation5 + $0x78] sm:$0xff] %v1244_v45  ;;  %1291 = vst [vmem:[#allocation5 + $0x70] sm:$0xff] %v1243_v19  ;;  %v1198_v29 = vmin.f32 %v910_v47, %v1150_v46  ;;  %v1197_v5 = vmin.f32 %v909_v44, %v1149_v15  ;;  %v1370_v47 = vld [vmem:[#allocation2 + $0x90] sm:$0xff]  ;;  %v870_v7 = vmin.f32 %v3450_v0, %v3449_v54  ;;  %v3451_v45 = vld [vmem:[#allocation109_spill] sm:$0xff] }
 0x204   :  { %v1076_v17 = vpop.permute.xlu1 %1075  ;;  %v1074_v52 = vpop.permute.xlu0 %1073  ;;  %v915_v48 = vmin.f32 %v3448_v42, %v867_v43  ;;  %v869_v19 = vmin.f32 %v3452_v49, %v3451_v45  ;;  %v3461_v13 = vld [vmem:[#allocation112_spill] sm:$0xff]  ;;  %v3463_v43 = vld [vmem:[#allocation113_spill] sm:$0xff]  ;;  %v3467_v54 = vld [vmem:[#allocation114_spill] sm:$0xff] }
 0x205   :  { %v1246_v31 = vsub.f32 %v1367_v62, %v1198_v29  ;;  %v1245_v26 = vsub.f32 %v1368_v1, %v1197_v5  ;;  %v1152_v38 = vmin.f32 %v2866_v57, %v1076_v17  ;;  %v1151_v55 = vmin.f32 %v2868_v4, %v1074_v52  ;;  %v1371_v29 = vld [vmem:[#allocation2 + $0xa8] sm:$0xff]  ;;  %v1372_v5 = vld [vmem:[#allocation2 + $0xa0] sm:$0xff]  ;;  %v3457_v52 = vld [vmem:[#allocation111_spill] sm:$0xff] }
 0x206   :  { %v918_v20 = vmin.f32 %v3453_v16, %v870_v7  ;;  %v917_v14 = vmin.f32 %v3454_v3, %v869_v19  ;;  %v872_v17 = vmin.f32 %v3456_v12, %v3455_v39  ;;  %v3458_v62 = vld [vmem:[#allocation71_spill] sm:$0xff]  ;;  %v3462_v58 = vld [vmem:[#allocation72_spill] sm:$0xff]  ;;  %v3468_v0 = vld [vmem:[#allocation74_spill] sm:$0xff] }
 0x207   :  { %1294 = vst [vmem:[#allocation5 + $0x88] sm:$0xff] %v1246_v31  ;;  %1293 = vst [vmem:[#allocation5 + $0x80] sm:$0xff] %v1245_v26  ;;  %v1200_v6 = vmin.f32 %v912_v30, %v1152_v38  ;;  %v1199_v9 = vmin.f32 %v911_v24, %v1151_v55  ;;  %v871_v31 = vmin.f32 %v3458_v62, %v3457_v52  ;;  %v1373_v38 = vld [vmem:[#allocation2 + $0xb8] sm:$0xff]  ;;  %v1374_v55 = vld [vmem:[#allocation2 + $0xb0] sm:$0xff] }
 0x208   :  { %v1080_v28 = vpop.permute.xlu1 %1079  ;;  %v1078_v35 = vpop.permute.xlu0 %1077  ;;  %v874_v22 = vmin.f32 %v3462_v58, %v3461_v13  ;;  %v3466_v42 = vld [vmem:[#allocation28_spill] sm:$0xff]  ;;  %v876_v7 = vmin.f32 %v3468_v0, %v3467_v54  ;;  %v3469_v45 = vld [vmem:[#allocation115_spill] sm:$0xff]  ;;  %v3472_v16 = vld [vmem:[#allocation30_spill] sm:$0xff] }
 0x209   :  { %v1248_v57 = vsub.f32 %v1369_v56, %v1200_v6  ;;  %v1247_v4 = vsub.f32 %v1370_v47, %v1199_v9  ;;  %v1154_v40 = vmin.f32 %v2874_v23, %v1080_v28  ;;  %v1153_v44 = vmin.f32 %v2876_v33, %v1078_v35  ;;  %v3464_v28 = vld [vmem:[#allocation73_spill] sm:$0xff]  ;;  %v3470_v49 = vld [vmem:[#allocation75_spill] sm:$0xff]  ;;  %v3473_v3 = vld [vmem:[#allocation116_spill] sm:$0xff] }
 0x20a   :  { %v919_v61 = vmin.f32 %v3460_v59, %v871_v31  ;;  %v873_v35 = vmin.f32 %v3464_v28, %v3463_v43  ;;  %v1375_v47 = vld [vmem:[#allocation2 + $0xc8] sm:$0xff]  ;;  %v875_v19 = vmin.f32 %v3470_v49, %v3469_v45  ;;  %v3481_v59 = vld [vmem:[#allocation118_spill] sm:$0xff]  ;;  %v3483_v58 = vld [vmem:[#allocation119_spill] sm:$0xff] }
 0x20b   :  { %1296 = vst [vmem:[#allocation5 + $0x98] sm:$0xff] %v1248_v57  ;;  %1295 = vst [vmem:[#allocation5 + $0x90] sm:$0xff] %v1247_v4  ;;  %v1202_v21 = vmin.f32 %v914_v37, %v1154_v40  ;;  %v1201_v18 = vmin.f32 %v913_v51, %v1153_v44  ;;  %v920_v51 = vmin.f32 %v3459_v41, %v872_v17  ;;  %v1376_v4 = vld [vmem:[#allocation2 + $0xc0] sm:$0xff]  ;;  %v3475_v12 = vld [vmem:[#allocation117_spill] sm:$0xff] }
 0x20c   :  { %v1084_v46 = vpop.permute.xlu1 %1083  ;;  %v1082_v15 = vpop.permute.xlu0 %1081  ;;  %v3476_v17 = vld [vmem:[#allocation77_spill] sm:$0xff]  ;;  %v3480_v41 = vld [vmem:[#allocation32_spill] sm:$0xff] }
 0x20d   :  { %v1250_v23 = vsub.f32 %v1371_v29, %v1202_v21  ;;  %v1249_v33 = vsub.f32 %v1372_v5, %v1201_v18  ;;  %v1156_v36 = vmin.f32 %v2882_v25, %v1084_v46  ;;  %v1155_v30 = vmin.f32 %v2884_v27, %v1082_v15  ;;  %v1377_v29 = vld [vmem:[#allocation2 + $0xd8] sm:$0xff]  ;;  %v3489_v54 = vld [vmem:[#allocation120_spill] sm:$0xff]  ;;  %v3491_v45 = vld [vmem:[#allocation121_spill] sm:$0xff] }
 0x20e   :  { %v877_v52 = vmin.f32 %v3476_v17, %v3475_v12  ;;  %v3490_v0 = vld [vmem:[#allocation80_spill] sm:$0xff]  ;;  %v3492_v49 = vld [vmem:[#allocation81_spill] sm:$0xff]  ;;  %v3498_v12 = vld [vmem:[#allocation82_spill] sm:$0xff] }
 0x20f   :  { %1298 = vst [vmem:[#allocation5 + $0xa8] sm:$0xff] %v1250_v23  ;;  %1297 = vst [vmem:[#allocation5 + $0xa0] sm:$0xff] %v1249_v33  ;;  %v1204_v53 = vmin.f32 %v916_v8, %v1156_v36  ;;  %v1203_v24 = vmin.f32 %v915_v48, %v1155_v30  ;;  %v922_v8 = vmin.f32 %v3465_v63, %v874_v22  ;;  %v1378_v23 = vld [vmem:[#allocation2 + $0xd0] sm:$0xff]  ;;  %v3484_v22 = vld [vmem:[#allocation79_spill] sm:$0xff] }
 0x210   :  { %v1088_v1 = vpop.permute.xlu1 %1087  ;;  %v1086_v26 = vpop.permute.xlu0 %1085  ;;  %v921_v48 = vmin.f32 %v3466_v42, %v873_v35  ;;  %v879_v43 = vmin.f32 %v3484_v22, %v3483_v58  ;;  %v3487_v63 = vld [vmem:[#allocation33_spill] sm:$0xff]  ;;  %v3488_v42 = vld [vmem:[#allocation34_spill] sm:$0xff]  ;;  %v3506_v58 = vld [vmem:[#allocation84_spill] sm:$0xff] }
 0x211   :  { %v1252_v25 = vsub.f32 %v1373_v38, %v1204_v53  ;;  %v1251_v27 = vsub.f32 %v1374_v55, %v1203_v24  ;;  %v1158_v6 = vmin.f32 %v2890_v2, %v1088_v1  ;;  %v1157_v9 = vmin.f32 %v2892_v50, %v1086_v26  ;;  %v3471_v53 = vld [vmem:[#allocation29_spill] sm:$0xff]  ;;  %v1380_v26 = vld [vmem:[#allocation2 + $0xe0] sm:$0xff] }
 0x212   :  { %v924_v24 = vmin.f32 %v3471_v53, %v876_v7  ;;  %v1379_v1 = vld [vmem:[#allocation2 + $0xe8] sm:$0xff]  ;;  %v3477_v38 = vld [vmem:[#allocation132_spill] sm:$0xff]  ;;  %v882_v7 = vmin.f32 %v3490_v0, %v3489_v54  ;;  %v3512_v54 = vld [vmem:[#allocation42_spill] sm:$0xff] }
 0x213   :  { %1300 = vst [vmem:[#allocation5 + $0xb8] sm:$0xff] %v1252_v25  ;;  %1299 = vst [vmem:[#allocation5 + $0xb0] sm:$0xff] %v1251_v27  ;;  %v1206_v60 = vmin.f32 %v918_v20, %v1158_v6  ;;  %v1205_v37 = vmin.f32 %v917_v14, %v1157_v9  ;;  %v923_v20 = vmin.f32 %v3472_v16, %v875_v19  ;;  %v3474_v14 = vld [vmem:[#allocation76_spill] sm:$0xff]  ;;  %v3478_v55 = vld [vmem:[#allocation133_spill] sm:$0xff] }
 0x214   :  { %v1092_v56 = vpop.permute.xlu1 %1091  ;;  %v1090_v57 = vpop.permute.xlu0 %1089  ;;  %v878_v39 = vmin.f32 %v3474_v14, %v3473_v3  ;;  %v881_v19 = vmin.f32 %v3492_v49, %v3491_v45  ;;  %v3495_v16 = vld [vmem:[#allocation35_spill] sm:$0xff]  ;;  %v3496_v3 = vld [vmem:[#allocation36_spill] sm:$0xff]  ;;  %v3514_v45 = vld [vmem:[#allocation86_spill] sm:$0xff] }
 0x215   :  { %v1254_v2 = vsub.f32 %v1375_v47, %v1206_v60  ;;  %v1253_v50 = vsub.f32 %v1376_v4, %v1205_v37  ;;  %v1160_v40 = vmin.f32 %v2898_v34, %v1092_v56  ;;  %v1159_v44 = vmin.f32 %v2900_v32, %v1090_v57  ;;  %v3479_v60 = vld [vmem:[#allocation31_spill] sm:$0xff]  ;;  %v1382_v47 = vld [vmem:[#allocation2 + $0xf0] sm:$0xff] }
 0x216   :  { %v926_v37 = vmin.f32 %v3479_v60, %v878_v39  ;;  %v1381_v56 = vld [vmem:[#allocation2 + $0xf8] sm:$0xff]  ;;  %v3485_v4 = vld [vmem:[#allocation134_spill] sm:$0xff]  ;;  %v929_v14 = vmin.f32 %v3496_v3, %v881_v19  ;;  %v3519_v3 = vld [vmem:[#allocation45_spill] sm:$0xff] }
 0x217   :  { %1302 = vst [vmem:[#allocation5 + $0xc8] sm:$0xff] %v1254_v2  ;;  %1301 = vst [vmem:[#allocation5 + $0xc0] sm:$0xff] %v1253_v50  ;;  %v1208_v21 = vmin.f32 %v920_v51, %v1160_v40  ;;  %v1207_v18 = vmin.f32 %v919_v61, %v1159_v44  ;;  %v925_v51 = vmin.f32 %v3480_v41, %v877_v52  ;;  %v3482_v61 = vld [vmem:[#allocation78_spill] sm:$0xff]  ;;  %v3486_v40 = vld [vmem:[#allocation135_spill] sm:$0xff] }
 0x218   :  { %v1096_v46 = vpop.permute.xlu1 %1095  ;;  %v1094_v15 = vpop.permute.xlu0 %1093  ;;  %v880_v13 = vmin.f32 %v3482_v61, %v3481_v59  ;;  %v3497_v39 = vld [vmem:[#allocation122_spill] sm:$0xff]  ;;  %v3499_v52 = vld [vmem:[#allocation123_spill] sm:$0xff]  ;;  %v3503_v41 = vld [vmem:[#allocation37_spill] sm:$0xff] }
 0x219   :  { %v1256_v34 = vsub.f32 %v1377_v29, %v1208_v21  ;;  %v1255_v32 = vsub.f32 %v1378_v23, %v1207_v18  ;;  %v1162_v5 = vmin.f32 %v2906_v10, %v1096_v46  ;;  %v1161_v33 = vmin.f32 %v2908_v11, %v1094_v15  ;;  %v1383_v29 = vld [vmem:[#allocation2 + $0x108] sm:$0xff]  ;;  %v1384_v23 = vld [vmem:[#allocation2 + $0x100] sm:$0xff]  ;;  %v3504_v59 = vld [vmem:[#allocation38_spill] sm:$0xff] }
 0x21a   :  { %v884_v17 = vmin.f32 %v3498_v12, %v3497_v39  ;;  %v3515_v19 = vld [vmem:[#allocation127_spill] sm:$0xff]  ;;  %v3520_v39 = vld [vmem:[#allocation46_spill] sm:$0xff] }
 0x21b   :  { %1304 = vst [vmem:[#allocation5 + $0xd8] sm:$0xff] %v1256_v34  ;;  %1303 = vst [vmem:[#allocation5 + $0xd0] sm:$0xff] %v1255_v32  ;;  %v1210_v36 = vmin.f32 %v922_v8, %v1162_v5  ;;  %v1209_v30 = vmin.f32 %v921_v48, %v1161_v33  ;;  %v928_v8 = vmin.f32 %v3487_v63, %v880_v13  ;;  %v3493_v5 = vld [vmem:[#allocation136_spill] sm:$0xff] }
 0x21c   :  { %v1100_v62 = vpop.permute.xlu1 %1099  ;;  %v1098_v31 = vpop.permute.xlu0 %1097  ;;  %v927_v48 = vmin.f32 %v3488_v42, %v879_v43  ;;  %v3505_v13 = vld [vmem:[#allocation124_spill] sm:$0xff]  ;;  %v3507_v43 = vld [vmem:[#allocation125_spill] sm:$0xff] }
 0x21d   :  { %v1258_v10 = vsub.f32 %v1379_v1, %v1210_v36  ;;  %v1257_v11 = vsub.f32 %v1380_v26, %v1209_v30  ;;  %v1164_v25 = vmin.f32 %v3477_v38, %v1100_v62  ;;  %v1163_v27 = vmin.f32 %v3478_v55, %v1098_v31  ;;  %v3494_v36 = vld [vmem:[#allocation137_spill] sm:$0xff]  ;;  %v3500_v62 = vld [vmem:[#allocation83_spill] sm:$0xff]  ;;  %v1386_v38 = vld [vmem:[#allocation2 + $0x110] sm:$0xff] }
 0x21e   :  { %v883_v31 = vmin.f32 %v3500_v62, %v3499_v52  ;;  %v1385_v26 = vld [vmem:[#allocation2 + $0x118] sm:$0xff]  ;;  %v3501_v55 = vld [vmem:[#allocation138_spill] sm:$0xff]  ;;  %v886_v22 = vmin.f32 %v3506_v58, %v3505_v13  ;;  %v3511_v42 = vld [vmem:[#allocation41_spill] sm:$0xff] }
 0x21f   :  { %1306 = vst [vmem:[#allocation5 + $0xe8] sm:$0xff] %v1258_v10  ;;  %1305 = vst [vmem:[#allocation5 + $0xe0] sm:$0xff] %v1257_v11  ;;  %v1212_v6 = vmin.f32 %v924_v24, %v1164_v25  ;;  %v1211_v9 = vmin.f32 %v923_v20, %v1163_v27  ;;  %v930_v20 = vmin.f32 %v3495_v16, %v882_v7  ;;  %v3513_v7 = vld [vmem:[#allocation126_spill] sm:$0xff]  ;;  %v3522_v52 = vld [vmem:[#allocation88_spill] sm:$0xff] }
 0x220   :  { %v1104_v28 = vpop.permute.xlu1 %1103  ;;  %v1102_v35 = vpop.permute.xlu0 %1101  ;;  %v931_v61 = vmin.f32 %v3504_v59, %v883_v31  ;;  %v888_v49 = vmin.f32 %v3514_v45, %v3513_v7  ;;  %v3523_v31 = vld [vmem:[#allocation129_spill] sm:$0xff]  ;;  %v3527_v59 = vld [vmem:[#allocation47_spill] sm:$0xff]  ;;  %v3528_v13 = vld [vmem:[#allocation48_spill] sm:$0xff] }
 0x221   :  { %v1260_v57 = vsub.f32 %v1381_v56, %v1212_v6  ;;  %v1259_v2 = vsub.f32 %v1382_v47, %v1211_v9  ;;  %v1166_v50 = vmin.f32 %v3485_v4, %v1104_v28  ;;  %v1165_v44 = vmin.f32 %v3486_v40, %v1102_v35  ;;  %v3502_v6 = vld [vmem:[#allocation139_spill] sm:$0xff]  ;;  %v3508_v28 = vld [vmem:[#allocation85_spill] sm:$0xff]  ;;  %v1388_v4 = vld [vmem:[#allocation2 + $0x120] sm:$0xff] }
 0x222   :  { %v885_v35 = vmin.f32 %v3508_v28, %v3507_v43  ;;  %v1387_v47 = vld [vmem:[#allocation2 + $0x128] sm:$0xff]  ;;  %v3509_v40 = vld [vmem:[#allocation140_spill] sm:$0xff]  ;;  %v3530_v43 = vld [vmem:[#allocation90_spill] sm:$0xff] }
 0x223   :  { %1308 = vst [vmem:[#allocation5 + $0xf8] sm:$0xff] %v1260_v57  ;;  %1307 = vst [vmem:[#allocation5 + $0xf0] sm:$0xff] %v1259_v2  ;;  %v1214_v21 = vmin.f32 %v926_v37, %v1166_v50  ;;  %v1213_v18 = vmin.f32 %v925_v51, %v1165_v44  ;;  %v932_v51 = vmin.f32 %v3503_v41, %v884_v17  ;;  %v3521_v17 = vld [vmem:[#allocation128_spill] sm:$0xff]  ;;  %v3536_v7 = vld [vmem:[#allocation51_spill] sm:$0xff] }
 0x224   :  { %v1108_v46 = vpop.permute.xlu1 %1107  ;;  %v1106_v15 = vpop.permute.xlu0 %1105  ;;  %v933_v0 = vmin.f32 %v3512_v54, %v885_v35  ;;  %v890_v62 = vmin.f32 %v3522_v52, %v3521_v17  ;;  %v3531_v35 = vld [vmem:[#allocation131_spill] sm:$0xff]  ;;  %v3535_v54 = vld [vmem:[#allocation50_spill] sm:$0xff] }
 0x225   :  { %v1262_v34 = vsub.f32 %v1383_v29, %v1214_v21  ;;  %v1261_v32 = vsub.f32 %v1384_v23, %v1213_v18  ;;  %v1168_v33 = vmin.f32 %v3493_v5, %v1108_v46  ;;  %v1167_v30 = vmin.f32 %v3494_v36, %v1106_v15  ;;  %v3510_v21 = vld [vmem:[#allocation141_spill] sm:$0xff]  ;;  %v3516_v46 = vld [vmem:[#allocation87_spill] sm:$0xff]  ;;  %v1390_v5 = vld [vmem:[#allocation2 + $0x130] sm:$0xff] }
 0x226   :  { %v887_v15 = vmin.f32 %v3516_v46, %v3515_v19  ;;  %v1389_v23 = vld [vmem:[#allocation2 + $0x138] sm:$0xff]  ;;  %v3517_v36 = vld [vmem:[#allocation142_spill] sm:$0xff]  ;;  %v1395_v46 = vld [vmem:[#allocation2 + $0x168] sm:$0xff] }
 0x227   :  { %1310 = vst [vmem:[#allocation5 + $0x108] sm:$0xff] %v1262_v34  ;;  %1309 = vst [vmem:[#allocation5 + $0x100] sm:$0xff] %v1261_v32  ;;  %v1216_v53 = vmin.f32 %v928_v8, %v1168_v33  ;;  %v1215_v24 = vmin.f32 %v927_v48, %v1167_v30  ;;  %v934_v48 = vmin.f32 %v3511_v42, %v886_v22  ;;  %v3529_v22 = vld [vmem:[#allocation130_spill] sm:$0xff] }
 0x228   :  { %v1112_v1 = vpop.permute.xlu1 %1111  ;;  %v1110_v10 = vpop.permute.xlu0 %1109  ;;  %v935_v12 = vmin.f32 %v3520_v39, %v887_v15  ;;  %v892_v28 = vmin.f32 %v3530_v43, %v3529_v22 }
 0x229   :  { %v1264_v11 = vsub.f32 %v1385_v26, %v1216_v53  ;;  %v1263_v25 = vsub.f32 %v1386_v38, %v1215_v24  ;;  %v1170_v27 = vmin.f32 %v3501_v55, %v1112_v1  ;;  %v1169_v9 = vmin.f32 %v3502_v6, %v1110_v10  ;;  %v3518_v53 = vld [vmem:[#allocation143_spill] sm:$0xff]  ;;  %v3524_v1 = vld [vmem:[#allocation89_spill] sm:$0xff]  ;;  %v1392_v55 = vld [vmem:[#allocation2 + $0x140] sm:$0xff] }
 0x22a   :  { %v889_v10 = vmin.f32 %v3524_v1, %v3523_v31  ;;  %v1391_v38 = vld [vmem:[#allocation2 + $0x148] sm:$0xff]  ;;  %v3525_v6 = vld [vmem:[#allocation144_spill] sm:$0xff] }
 0x22b   :  { %1312 = vst [vmem:[#allocation5 + $0x118] sm:$0xff] %v1264_v11  ;;  %1311 = vst [vmem:[#allocation5 + $0x110] sm:$0xff] %v1263_v25  ;;  %v1218_v60 = vmin.f32 %v930_v20, %v1170_v27  ;;  %v1217_v37 = vmin.f32 %v929_v14, %v1169_v9  ;;  %v936_v14 = vmin.f32 %v3519_v3, %v888_v49 }
 0x22c   :  { %v1116_v56 = vpop.permute.xlu1 %1115  ;;  %v1114_v57 = vpop.permute.xlu0 %1113  ;;  %v937_v58 = vmin.f32 %v3528_v13, %v889_v10 }
 0x22d   :  { %v1266_v2 = vsub.f32 %v1387_v47, %v1218_v60  ;;  %v1265_v50 = vsub.f32 %v1388_v4, %v1217_v37  ;;  %v1172_v44 = vmin.f32 %v3509_v40, %v1116_v56  ;;  %v1171_v18 = vmin.f32 %v3510_v21, %v1114_v57  ;;  %v3526_v60 = vld [vmem:[#allocation145_spill] sm:$0xff]  ;;  %v3532_v56 = vld [vmem:[#allocation91_spill] sm:$0xff]  ;;  %v1394_v40 = vld [vmem:[#allocation2 + $0x150] sm:$0xff] }
 0x22e   :  { %v891_v57 = vmin.f32 %v3532_v56, %v3531_v35  ;;  %v1393_v4 = vld [vmem:[#allocation2 + $0x158] sm:$0xff]  ;;  %v3533_v21 = vld [vmem:[#allocation146_spill] sm:$0xff] }
 0x22f   :  { %1314 = vst [vmem:[#allocation5 + $0x128] sm:$0xff] %v1266_v2  ;;  %1313 = vst [vmem:[#allocation5 + $0x120] sm:$0xff] %v1265_v50  ;;  %v1220_v63 = vmin.f32 %v932_v51, %v1172_v44  ;;  %v1219_v8 = vmin.f32 %v931_v61, %v1171_v18  ;;  %v938_v61 = vmin.f32 %v3527_v59, %v890_v62 }
 0x230   :  { %v1120_v29 = vpop.permute.xlu1 %1119  ;;  %v1118_v34 = vpop.permute.xlu0 %1117  ;;  %v939_v45 = vmin.f32 %v3536_v7, %v891_v57 }
 0x231   :  { %v1268_v32 = vsub.f32 %v1389_v23, %v1220_v63  ;;  %v1267_v33 = vsub.f32 %v1390_v5, %v1219_v8  ;;  %v1174_v30 = vmin.f32 %v3517_v36, %v1120_v29  ;;  %v1173_v24 = vmin.f32 %v3518_v53, %v1118_v34  ;;  %v3534_v63 = vld [vmem:[#allocation147_spill] sm:$0xff]  ;;  %v1396_v29 = vld [vmem:[#allocation2 + $0x160] sm:$0xff]  ;;  %v3538_v5 = vld [vmem:[#allocation149_spill] sm:$0xff] }
 0x232   :  { %v3537_v23 = vld [vmem:[#allocation148_spill] sm:$0xff]  ;;  %v1397_v53 = vld [vmem:[#allocation2 + $0x178] sm:$0xff] }
 0x233   :  { %1316 = vst [vmem:[#allocation5 + $0x138] sm:$0xff] %v1268_v32  ;;  %1315 = vst [vmem:[#allocation5 + $0x130] sm:$0xff] %v1267_v33  ;;  %v1222_v16 = vmin.f32 %v934_v48, %v1174_v30  ;;  %v1221_v20 = vmin.f32 %v933_v0, %v1173_v24  ;;  %v940_v0 = vmin.f32 %v3535_v54, %v892_v28 }
 0x234   :  { %v1124_v26 = vpop.permute.xlu1 %1123  ;;  %v1122_v11 = vpop.permute.xlu0 %1121 }
 0x235   :  { %v1270_v25 = vsub.f32 %v1391_v38, %v1222_v16  ;;  %v1269_v27 = vsub.f32 %v1392_v55, %v1221_v20  ;;  %v1176_v9 = vmin.f32 %v3525_v6, %v1124_v26  ;;  %v1175_v37 = vmin.f32 %v3526_v60, %v1122_v11  ;;  %v1398_v16 = vld [vmem:[#allocation2 + $0x170] sm:$0xff] }
 0x237   :  { %1318 = vst [vmem:[#allocation5 + $0x148] sm:$0xff] %v1270_v25  ;;  %1317 = vst [vmem:[#allocation5 + $0x140] sm:$0xff] %v1269_v27  ;;  %v1224_v41 = vmin.f32 %v936_v14, %v1176_v9  ;;  %v1223_v51 = vmin.f32 %v935_v12, %v1175_v37 }
 0x238   :  { %v1128_v47 = vpop.permute.xlu1 %1127  ;;  %v1126_v2 = vpop.permute.xlu0 %1125 }
 0x239   :  { %v1272_v50 = vsub.f32 %v1393_v4, %v1224_v41  ;;  %v1271_v44 = vsub.f32 %v1394_v40, %v1223_v51  ;;  %v1178_v18 = vmin.f32 %v3533_v21, %v1128_v47  ;;  %v1177_v8 = vmin.f32 %v3534_v63, %v1126_v2 }
 0x23b   :  { %1320 = vst [vmem:[#allocation5 + $0x158] sm:$0xff] %v1272_v50  ;;  %1319 = vst [vmem:[#allocation5 + $0x150] sm:$0xff] %v1271_v44  ;;  %v1226_v42 = vmin.f32 %v938_v61, %v1178_v18  ;;  %v1225_v48 = vmin.f32 %v937_v58, %v1177_v8 }
 0x23c   :  { %v1132_v49 = vpop.permute.xlu1 %1131  ;;  %v1130_v19 = vpop.permute.xlu0 %1129 }
 0x23d   :  { %v1274_v15 = vsub.f32 %v1395_v46, %v1226_v42  ;;  %v1273_v34 = vsub.f32 %v1396_v29, %v1225_v48  ;;  %v1180_v32 = vmin.f32 %v3537_v23, %v1132_v49  ;;  %v1179_v33 = vmin.f32 %v3538_v5, %v1130_v19 }
 0x23f   :  { %1322 = vst [vmem:[#allocation5 + $0x168] sm:$0xff] %v1274_v15  ;;  %1321 = vst [vmem:[#allocation5 + $0x160] sm:$0xff] %v1273_v34  ;;  %v1228_v36 = vmin.f32 %v940_v0, %v1180_v32  ;;  %v1227_v30 = vmin.f32 %v939_v45, %v1179_v33 }
 0x241   :  { %v1276_v24 = vsub.f32 %v1397_v53, %v1228_v36  ;;  %v1275_v20 = vsub.f32 %v1398_v16, %v1227_v30 }
 0x243   :  { %1324 = vst [vmem:[#allocation5 + $0x178] sm:$0xff] %v1276_v24  ;;  %1323 = vst [vmem:[#allocation5 + $0x170] sm:$0xff] %v1275_v20 }
 0x244   :  { %1432 = shalt.err (!%p1429_p12)
}
 0x245   :  { %s1433_s28 = scalar_lea.hbm %s3174_s1, 6144 }
 0x246   :  { %p1434_p13 = scmp.ne.s32.totalorder %s3174_s1, %s1433_s28  ;;  %p1437_p0 = scmp.lt.u32.totalorder %s1433_s28, %s3174_s1 }
 0x248   :  { %p1439_p1 = pnand %p1437_p0, %p1434_p13 }
 0x24a   :  { %1442 = shalt.err (!%p1439_p1)
}
 0x24b   :  { %1336 = dma.vmem_to_hbm [thread:$0]  %s1331_s24, 6144, %s3174_s1, [#allocation4], %s1448_s16, %s1448_s16, %s1449_s17  }
 0x24c   :  { %1445 = dma.done.wait [#allocation4], 6144  }
 0x24d   :  { %1446 = vsyncadd [#allocation4], 4294961152 }
 0x24e   :  { %1340 = vsyncpa [#allocation3], 1 }
 0x24f   :  { %1341 = vsyncpa [#allocation4], 1 }

</bundles_post_ra>
